<compile_context>
chip_gen: v6e
topology: v6e:2x2x1
jax: 0.10.0
libtpu: 0.0.40
codegen_flags: <defaults>
</compile_context>

<pallas_src>
import functools
import math

import jax
import jax.numpy as jnp
import numpy as np
from jax.experimental import pallas as pl
from jax.experimental.pallas import tpu as pltpu


def _linear_attention_arma_kernel(x_ref, mask_ref, wqk_ref, wcp_ref, o_ref, *,
                                  n_head, compute_dtype):
    bt, L, D = x_ref.shape
    d = D // n_head

    x = x_ref[...]                                   # (bt, L, D) float32
    xc = x.astype(compute_dtype)

    # Fused q1|k1 projection on the flattened (bt*L, D) slab.
    qk = jnp.dot(xc.reshape(bt * L, D), wqk_ref[...],
                 preferred_element_type=jnp.float32)          # (bt*L, 2D) f32
    qk = qk.reshape(bt, L, 2 * D)
    q = qk[:, :, :D]
    k = qk[:, :, D:]

    mask = mask_ref[...]                             # (L, L) lower-tri ones, f32

    head_outs = []
    for h in range(n_head):                          # static, unrolled
        sl = slice(h * d, (h + 1) * d)
        qh = q[:, :, sl].astype(compute_dtype)       # (bt, L, d)
        kh = k[:, :, sl].astype(compute_dtype)       # (bt, L, d)
        vh = xc[:, :, sl]                            # (bt, L, d)
        s = jnp.einsum('bld,btd->blt', qh, kh,
                       preferred_element_type=jnp.float32)    # (bt, L, L)
        s = s * mask[None]                           # causal: keep t <= l
        ah = jnp.einsum('blt,btd->bld', s.astype(compute_dtype), vh,
                        preferred_element_type=jnp.float32)   # (bt, L, d)
        head_outs.append(ah)

    attn = jnp.concatenate(head_outs, axis=-1)       # (bt, L, D) == X_attn

    # Module as written:  X = dropout(X_attn); XE = dropout_ma(X)  =>  XE == X
    # in eval mode, so c_proj sees X + XE = 2 * X_attn.
    y = (2.0 * attn).astype(compute_dtype).reshape(bt * L, D)
    out = jnp.dot(y, wcp_ref[...], preferred_element_type=jnp.float32)
    o_ref[...] = out.reshape(bt, L, D).astype(o_ref.dtype)


def linear_attention_arma(x, wq1_t, wk1_t, wcp_t, *, n_head,
                          block_b=8, compute_dtype=jnp.float32):
    """LinearAttentionARMA forward (eval mode, bias=False).

    Linear weights are passed pre-transposed as (D_in, D_out) so the kernel
    computes x @ W (== PyTorch x @ W.T).  k2's weight is not needed: the MA
    branch is overwritten before reaching the output in the module as written.
    """
    B, L, D = x.shape
    assert D % n_head == 0, "n_embd must be divisible by n_head"
    block_b = min(block_b, B)
    if B % block_b:
        block_b = math.gcd(B, block_b)

    wqk = jnp.concatenate([wq1_t, wk1_t], axis=1).astype(compute_dtype)  # (D, 2D)
    wcp = wcp_t.astype(compute_dtype)                                    # (D, D)
    mask = jnp.tril(jnp.ones((L, L), jnp.float32))                       # causal

    kernel = functools.partial(_linear_attention_arma_kernel,
                               n_head=n_head, compute_dtype=compute_dtype)

    return pl.pallas_call(
        kernel,
        out_shape=jax.ShapeDtypeStruct((B, L, D), jnp.float32),
        grid_spec=pltpu.PrefetchScalarGridSpec(
            num_scalar_prefetch=0,
            grid=(B // block_b,),
            in_specs=[
                pl.BlockSpec((block_b, L, D), lambda b: (b, 0, 0)),
                pl.BlockSpec((L, L), lambda b: (0, 0)),        # mask: DMA'd once
                pl.BlockSpec((D, 2 * D), lambda b: (0, 0)),    # fused q1|k1
                pl.BlockSpec((D, D), lambda b: (0, 0)),        # c_proj
            ],
            out_specs=pl.BlockSpec((block_b, L, D), lambda b: (b, 0, 0)),
        ),
        compiler_params=pltpu.CompilerParams(
            dimension_semantics=("parallel",)),
    )(x, mask, wqk, wcp)


def _reference_forward(X, wq1_t, wk1_t, wk2_t, wcp_t, n_head):
    """Line-by-line JAX translation of LinearAttentionARMA.forward
    (dropout / dropout_ma = identity, bias=False)."""
    B, L, D = X.shape
    H = n_head
    d = D // H
    Q = (X @ wq1_t).reshape(B, L, H, d)
    K = (X @ wk1_t).reshape(B, L, H, d)[..., None]                       # (B,L,H,d,1)
    V = jnp.transpose(X.reshape(B, L, H, d)[..., None], (0, 1, 2, 4, 3))  # (B,L,H,1,d)
    # ma_k_activation: last dim at call time is D
    k2 = jax.nn.sigmoid(0.02 * (X[:, :-1] @ wk2_t) / math.sqrt(D))
    k2 = k2.reshape(B, L - 1, H, d)[..., None]                           # (B,L-1,H,d,1)
    # ma_q_activation: last dim at call time is d
    y = -Q[:, :-1] / math.sqrt(d)
    q2 = -jnp.where(y >= 0.0, y, 0.02 * y)
    W = jnp.einsum('blhdk,blhke->blhde', K, V)
    W = jnp.cumsum(W, axis=1)
    Xattn = jnp.einsum('blhd,blhde->blhe', Q, W)                         # (B,L,H,d)
    Y = Xattn[:, :, :, None, :]                                          # (B,L,H,1,d)
    E = V[:, 1:] - Y[:, :-1]
    WE = jnp.einsum('blhdk,blhke->blhde', k2, E)
    WE = jnp.cumsum(WE, axis=1)
    XE = jnp.einsum('blhd,blhde->blhe', q2, WE)
    XE = jnp.concatenate([jnp.zeros_like(XE[:, :1]), XE], axis=1)
    # NOTE: the original module overwrites XE on the next line
    # (`XE = self.dropout_ma(X)`), so the MA branch above never reaches the
    # output.  Kept here only for a faithful translation.
    del XE
    Xr = Xattn.reshape(B, L, D)            # X  = self.dropout(X).reshape(B,L,D)
    XEr = Xr                               # XE = self.dropout_ma(X).reshape(B,L,D)
    return (Xr + XEr) @ wcp_t              # self.c_proj(X + XE)


if __name__ == "__main__":
    B, L, D, H = 16, 16, 256, 2            # batch, seq, n_embd, n_head (d = 128)
    key = jax.random.PRNGKey(0)
    kx, kq, kk, kk2, kc = jax.random.split(key, 5)

    x = jax.random.normal(kx, (B, L, D), dtype=jnp.float32)
    scale = 0.02
    wq1_t = scale * jax.random.normal(kq, (D, D), dtype=jnp.float32)
    wk1_t = scale * jax.random.normal(kk, (D, D), dtype=jnp.float32)
    wk2_t = scale * jax.random.normal(kk2, (D, D), dtype=jnp.float32)  # dead MA branch only
    wcp_t = scale * jax.random.normal(kc, (D, D), dtype=jnp.float32)

    # f32 path: strict check against the line-by-line module translation.
    out = linear_attention_arma(x, wq1_t, wk1_t, wcp_t, n_head=H, block_b=8)
    out = jax.block_until_ready(out)

    ref = jax.block_until_ready(
        _reference_forward(x, wq1_t, wk1_t, wk2_t, wcp_t, H))
    np.testing.assert_allclose(np.asarray(out), np.asarray(ref),
                               rtol=1e-4, atol=1e-4)

    # bf16 MXU-operand fast path (perf-review item): f32 accumulation but bf16
    # operand rounding gives ~1% numerics, so only a loose sanity check here.
    out_bf16 = jax.block_until_ready(
        linear_attention_arma(x, wq1_t, wk1_t, wcp_t, n_head=H, block_b=8,
                              compute_dtype=jnp.bfloat16))
    np.testing.assert_allclose(np.asarray(out_bf16), np.asarray(ref),
                               rtol=5e-2, atol=5e-1)

    print("KERNEL_OK")
</pallas_src>

<mosaic_0001>
module attributes {stable_mosaic.version = 11 : i64} {
  func.func @_linear_attention_arma_kernel(%arg0: i32, %arg1: memref<8x16x256xf32, #tpu.memory_space<vmem>>, %arg2: memref<16x16xf32, #tpu.memory_space<vmem>>, %arg3: memref<256x512xf32, #tpu.memory_space<vmem>>, %arg4: memref<256x256xf32, #tpu.memory_space<vmem>>, %arg5: memref<8x16x256xf32, #tpu.memory_space<vmem>>) attributes {dimension_semantics = [#tpu.dimension_semantics<parallel>], iteration_bounds = array<i64: 2>, scalar_prefetch = 0 : i64, scratch_operands = 0 : i64, tpu.core_type = #tpu.core_type<tc>, window_params = [{transform_indices = @transform_0, window_bounds = array<i64: 8, 16, 256>}, {pipeline_mode = #tpu.pipeline_mode<synchronous>, transform_indices = @transform_1, window_bounds = array<i64: 16, 16>}, {pipeline_mode = #tpu.pipeline_mode<synchronous>, transform_indices = @transform_2, window_bounds = array<i64: 256, 512>}, {pipeline_mode = #tpu.pipeline_mode<synchronous>, transform_indices = @transform_3, window_bounds = array<i64: 256, 256>}, {transform_indices = @transform_4, window_bounds = array<i64: 8, 16, 256>}]} {
    %c0 = arith.constant 0 : index
    %c0_0 = arith.constant 0 : index
    %c0_1 = arith.constant 0 : index
    %0 = vector.load %arg1[%c0, %c0_0, %c0_1] : memref<8x16x256xf32, #tpu.memory_space<vmem>>, vector<8x16x256xf32>
    %1 = vector.shape_cast %0 : vector<8x16x256xf32> to vector<128x256xf32>
    %c0_2 = arith.constant 0 : index
    %c0_3 = arith.constant 0 : index
    %2 = vector.load %arg3[%c0_2, %c0_3] : memref<256x512xf32, #tpu.memory_space<vmem>>, vector<256x512xf32>
    %cst = arith.constant dense<0.000000e+00> : vector<128x512xf32>
    %3 = tpu.matmul %1, %2, %cst {dimension_numbers = #tpu.dot_dimension_numbers<[1], [0], [0], [1], [0, 0, 1, 1], [], []>} : vector<128x256xf32>, vector<256x512xf32>, vector<128x512xf32> -> vector<128x512xf32>
    %4 = vector.shape_cast %3 : vector<128x512xf32> to vector<8x16x512xf32>
    %5 = vector.extract_strided_slice %4 {offsets = [0, 0, 0], sizes = [8, 16, 256], strides = [1, 1, 1]} : vector<8x16x512xf32> to vector<8x16x256xf32>
    %6 = vector.extract_strided_slice %4 {offsets = [0, 0, 256], sizes = [8, 16, 256], strides = [1, 1, 1]} : vector<8x16x512xf32> to vector<8x16x256xf32>
    %c0_4 = arith.constant 0 : index
    %c0_5 = arith.constant 0 : index
    %7 = vector.load %arg2[%c0_4, %c0_5] : memref<16x16xf32, #tpu.memory_space<vmem>>, vector<16x16xf32>
    %8 = vector.extract_strided_slice %5 {offsets = [0, 0, 0], sizes = [8, 16, 128], strides = [1, 1, 1]} : vector<8x16x256xf32> to vector<8x16x128xf32>
    %9 = vector.extract_strided_slice %6 {offsets = [0, 0, 0], sizes = [8, 16, 128], strides = [1, 1, 1]} : vector<8x16x256xf32> to vector<8x16x128xf32>
    %10 = vector.extract_strided_slice %0 {offsets = [0, 0, 0], sizes = [8, 16, 128], strides = [1, 1, 1]} : vector<8x16x256xf32> to vector<8x16x128xf32>
    "tpu.trace_start"() <{level = 10 : i32, message = "bld,btd->blt"}> : () -> ()
    %cst_6 = arith.constant dense<0.000000e+00> : vector<8x16x16xf32>
    %11 = tpu.matmul %8, %9, %cst_6 {dimension_numbers = #tpu.dot_dimension_numbers<[2], [2], [1], [1], [0, 0, 0, 1, 1, 1], [0], [0]>} : vector<8x16x128xf32>, vector<8x16x128xf32>, vector<8x16x16xf32> -> vector<8x16x16xf32>
    "tpu.trace_stop"() : () -> ()
    %12 = vector.shape_cast %7 : vector<16x16xf32> to vector<1x16x16xf32>
    %13 = vector.broadcast %12 : vector<1x16x16xf32> to vector<8x16x16xf32>
    %14 = arith.mulf %11, %13 : vector<8x16x16xf32>
    "tpu.trace_start"() <{level = 10 : i32, message = "blt,btd->bld"}> : () -> ()
    %cst_7 = arith.constant dense<0.000000e+00> : vector<8x16x128xf32>
    %15 = tpu.matmul %14, %10, %cst_7 {dimension_numbers = #tpu.dot_dimension_numbers<[2], [1], [1], [2], [0, 0, 0, 1, 1, 2], [0], [0]>} : vector<8x16x16xf32>, vector<8x16x128xf32>, vector<8x16x128xf32> -> vector<8x16x128xf32>
    "tpu.trace_stop"() : () -> ()
    %16 = vector.extract_strided_slice %5 {offsets = [0, 0, 128], sizes = [8, 16, 128], strides = [1, 1, 1]} : vector<8x16x256xf32> to vector<8x16x128xf32>
    %17 = vector.extract_strided_slice %6 {offsets = [0, 0, 128], sizes = [8, 16, 128], strides = [1, 1, 1]} : vector<8x16x256xf32> to vector<8x16x128xf32>
    %18 = vector.extract_strided_slice %0 {offsets = [0, 0, 128], sizes = [8, 16, 128], strides = [1, 1, 1]} : vector<8x16x256xf32> to vector<8x16x128xf32>
    "tpu.trace_start"() <{level = 10 : i32, message = "bld,btd->blt"}> : () -> ()
    %cst_8 = arith.constant dense<0.000000e+00> : vector<8x16x16xf32>
    %19 = tpu.matmul %16, %17, %cst_8 {dimension_numbers = #tpu.dot_dimension_numbers<[2], [2], [1], [1], [0, 0, 0, 1, 1, 1], [0], [0]>} : vector<8x16x128xf32>, vector<8x16x128xf32>, vector<8x16x16xf32> -> vector<8x16x16xf32>
    "tpu.trace_stop"() : () -> ()
    %20 = vector.shape_cast %7 : vector<16x16xf32> to vector<1x16x16xf32>
    %21 = vector.broadcast %20 : vector<1x16x16xf32> to vector<8x16x16xf32>
    %22 = arith.mulf %19, %21 : vector<8x16x16xf32>
    "tpu.trace_start"() <{level = 10 : i32, message = "blt,btd->bld"}> : () -> ()
    %cst_9 = arith.constant dense<0.000000e+00> : vector<8x16x128xf32>
    %23 = tpu.matmul %22, %18, %cst_9 {dimension_numbers = #tpu.dot_dimension_numbers<[2], [1], [1], [2], [0, 0, 0, 1, 1, 2], [0], [0]>} : vector<8x16x16xf32>, vector<8x16x128xf32>, vector<8x16x128xf32> -> vector<8x16x128xf32>
    "tpu.trace_stop"() : () -> ()
    %24 = tpu.concatenate %15, %23 in 2 : vector<8x16x128xf32>, vector<8x16x128xf32> -> vector<8x16x256xf32>
    %cst_10 = arith.constant 2.000000e+00 : f32
    %25 = vector.broadcast %cst_10 : f32 to vector<8x16x256xf32>
    %26 = arith.mulf %25, %24 : vector<8x16x256xf32>
    %27 = vector.shape_cast %26 : vector<8x16x256xf32> to vector<128x256xf32>
    %c0_11 = arith.constant 0 : index
    %c0_12 = arith.constant 0 : index
    %28 = vector.load %arg4[%c0_11, %c0_12] : memref<256x256xf32, #tpu.memory_space<vmem>>, vector<256x256xf32>
    %cst_13 = arith.constant dense<0.000000e+00> : vector<128x256xf32>
    %29 = tpu.matmul %27, %28, %cst_13 {dimension_numbers = #tpu.dot_dimension_numbers<[1], [0], [0], [1], [0, 0, 1, 1], [], []>} : vector<128x256xf32>, vector<256x256xf32>, vector<128x256xf32> -> vector<128x256xf32>
    %30 = vector.shape_cast %29 : vector<128x256xf32> to vector<8x16x256xf32>
    %c0_14 = arith.constant 0 : index
    %c0_15 = arith.constant 0 : index
    %c0_16 = arith.constant 0 : index
    %31 = vector.load %arg5[%c0_14, %c0_15, %c0_16] : memref<8x16x256xf32, #tpu.memory_space<vmem>>, vector<8x16x256xf32>
    tpu.vector_store %arg5[%c0_14, %c0_15, %c0_16], %30 {strides = array<i32>} : memref<8x16x256xf32, #tpu.memory_space<vmem>>, vector<8x16x256xf32>,
    return
  }
  func.func @transform_0(%arg0: i32) -> (i32, i32, i32) {
    %c0_i32 = arith.constant 0 : i32
    %c0_i32_0 = arith.constant 0 : i32
    %c0_i32_1 = arith.constant 0 : i32
    return %arg0, %c0_i32, %c0_i32_0 : i32, i32, i32
  }
  func.func @transform_1(%arg0: i32) -> (i32, i32) {
    %c0_i32 = arith.constant 0 : i32
    %c0_i32_0 = arith.constant 0 : i32
    %c0_i32_1 = arith.constant 0 : i32
    return %c0_i32, %c0_i32_0 : i32, i32
  }
  func.func @transform_2(%arg0: i32) -> (i32, i32) {
    %c0_i32 = arith.constant 0 : i32
    %c0_i32_0 = arith.constant 0 : i32
    %c0_i32_1 = arith.constant 0 : i32
    return %c0_i32, %c0_i32_0 : i32, i32
  }
  func.func @transform_3(%arg0: i32) -> (i32, i32) {
    %c0_i32 = arith.constant 0 : i32
    %c0_i32_0 = arith.constant 0 : i32
    %c0_i32_1 = arith.constant 0 : i32
    return %c0_i32, %c0_i32_0 : i32, i32
  }
  func.func @transform_4(%arg0: i32) -> (i32, i32, i32) {
    %c0_i32 = arith.constant 0 : i32
    %c0_i32_0 = arith.constant 0 : i32
    %c0_i32_1 = arith.constant 0 : i32
    return %arg0, %c0_i32, %c0_i32_0 : i32, i32, i32
  }
}

</mosaic_0001>

<bundles_post_ra>
// kernel: tpu_custom_call.1
= control target key start
LH: loop header
LB: loop body
LE: loop exit
PB: predicated region body
PF: predicated region fallthrough
CT: control target
= control target key end

     0   :  { %9 = vsyncpa [#allocation3], 0  ;;  %s5111_s0 = inlined_call_operand.hbm [shape: f32[16,16,256], index: 0, kind: input, shape index: {}]   ;;  %s5112_s1 = inlined_call_operand.hbm [shape: f32[16,16], index: 1, kind: input, shape index: {}]   ;;  %s5113_s2 = inlined_call_operand.hbm [shape: f32[256,512], index: 2, kind: input, shape index: {}]   ;;  %s5114_s3 = inlined_call_operand.hbm [shape: f32[256,256], index: 3, kind: input, shape index: {}]   ;;  %s5115_s4 = inlined_call_operand.hbm [shape: f32[16,16,256], index: 4, kind: output, shape index: {}]  }
   0x1   :  { %11 = vsyncpa [#allocation3 + $0x1], 0 }
   0x2   :  { %12 = vsyncpa [#allocation6], 0 }
   0x3   :  { %13 = vsyncpa [#allocation9], 0 }
   0x4   :  { %14 = vsyncpa [#allocation4], 0 }
   0x5   :  { %16 = vsyncpa [#allocation4 + $0x1], 0  ;;  %s4396_s15 = smov 0   ;;  %s4398_s16 = smov 0  }
   0x6   :  { %s4400_s17 = smov 0   ;;  %s4402_s18 = smov 0  }
   0x7 LB: > { %s4417_s19 = sadd.s32 4294967295, %s4356_s18   ;;  %s3682_s20 = sadd.s32 4294967294, %s4356_s18   ;;  %s4356_s18 = sphi %s4402_s18, %s5171_s18   ;;  %s4352_s17 = sphi %s4400_s17, %s5170_s17   ;;  %s4348_s16 = sphi %s4398_s16, %s5169_s16   ;;  %s4344_s15 = sphi %s4396_s15, %s5168_s15  }
   0x8   : > { %p42_p0 = scmp.ne.s32.totalorder %s4348_s16, %s4344_s15  ;;  %p5116_p1 = scmp.eq.s32.totalorder %s4417_s19, 0 }
   0x9   : > { %p135_p3 = scmp.eq.s32.totalorder %s3682_s20, 1  ;;  %p3683_p5 = scmp.ge.s32.totalorder %s4356_s18, 1 }
   0xa   : > { %p4426_p4 = por %p5116_p1, %p42_p0  ;;  %p142_p7 = scmp.lt.s32.totalorder %s4356_s18, 3 }
   0xb   : > { %p4431_p6 = por %p135_p3, %p42_p0  ;;  %s4358_s24 = smov [#allocation5]  }
   0xc   : > { %s5136_s21 = scalar_select %p4426_p4, 1, 0 }
   0xd   : > { %s5137_s22 = scalar_select %p4431_p6, 1, 0 }
   0xe   : > { %p4436_p8 = pnand %p3683_p5, %p142_p7  ;;  %s154_s25 = sshll.u32 %s4358_s24, 4  ;;  %s155_s25 = int_to_ptr.vmem [resolvable:$true] %s154_s25 }
   0xf   : > { %s4359_s27 = smov [#allocation7]   ;;  %s4189_s29 = scalar_lea.vmem %s155_s25, 256 }
  0x10   : > { %s5138_s23 = scalar_select %p4436_p8, 1, 0 }
  0x11   : > { %p4108_p9 = pneg %p4436_p8  ;;  %s167_s28 = sshll.u32 %s4359_s27, 4  ;;  %s168_s28 = int_to_ptr.vmem [resolvable:$true] %s167_s28 }
  0x12   : > { %p4190_p13 = scmp.ne.s32.totalorder %s155_s25, %s4189_s29  ;;  %p4197_p5 = scmp.lt.s32.totalorder %s155_s25, %s155_s25 }
  0x13   : > { %p4445_p11 = pnand %p4108_p9, %p5116_p1  ;;  %p4198_p7 = scmp.lt.s32.totalorder %s4189_s29, %s4189_s29 }
  0x15   : > { %p4180_p12 = pneg %p4445_p11  ;;  %p4199_p10 = por %p4198_p7, %p4197_p5 }
  0x17   : > { %p4192_p0 = pnand %p4190_p13, %p4180_p12 }
  0x19   : > { %p4193_p3 = pneg %p4192_p0 }
  0x1b   : > { %p4200_p9 = pnand %p4199_p10, %p4193_p3 }
  0x1d   : > { %4203 = shalt.err (!%p4200_p9)
}
  0x1e   : > { %s4360_s30 = smov 128   ;;  %s4361_s5 = smov 8  }
  0x1f   : > { %4111 = dma.hbm_to_vmem [thread:$0]  (!%p4445_p11), %s5112_s1, 256, %s155_s25, [#allocation6], %s4360_s30, %s4360_s30, %s4361_s5  }
  0x20   : > { %s4215_s8 = scalar_lea.vmem %s168_s28, 16384  ;;  %p4223_p2 = scmp.lt.s32.totalorder %s168_s28, %s168_s28 }
  0x21   : > { %p4216_p1 = scmp.ne.s32.totalorder %s168_s28, %s4215_s8  ;;  %p4224_p6 = scmp.lt.s32.totalorder %s4215_s8, %s4215_s8 }
  0x23   : > { %p4218_p13 = pnand %p4216_p1, %p4180_p12  ;;  %p4225_p5 = por %p4224_p6, %p4223_p2 }
  0x25   : > { %p4219_p0 = pneg %p4218_p13 }
  0x27   : > { %p4226_p10 = pnand %p4225_p5, %p4219_p0 }
  0x29   : > { %4229 = shalt.err (!%p4226_p10)
}
  0x2a   : > { %s4362_s9 = smov 512   ;;  %s4363_s10 = smov 32  }
  0x2b   : > { %4114 = dma.hbm_to_vmem [thread:$0]  (!%p4445_p11), %s5113_s2, 16384, %s168_s28, [#allocation6], %s4362_s9, %s4362_s9, %s4363_s10  }
  0x2c   : > { %s4364_s13 = smov [#allocation8]  }
  0x2d   : > { %s180_s14 = sshll.u32 %s4364_s13, 4  ;;  %s181_s14 = int_to_ptr.vmem [resolvable:$true] %s180_s14 }
  0x2e   : > { %s4241_s20 = scalar_lea.vmem %s181_s14, 8192  ;;  %p4249_p6 = scmp.lt.s32.totalorder %s181_s14, %s181_s14 }
  0x2f   : > { %p4242_p1 = scmp.ne.s32.totalorder %s181_s14, %s4241_s20  ;;  %p4250_p7 = scmp.lt.s32.totalorder %s4241_s20, %s4241_s20 }
  0x31   : > { %p4244_p3 = pnand %p4242_p1, %p4180_p12  ;;  %p4251_p9 = por %p4250_p7, %p4249_p6 }
  0x33   : > { %p4245_p2 = pneg %p4244_p3 }
  0x35   : > { %p4252_p13 = pnand %p4251_p9, %p4245_p2 }
  0x37   : > { %4255 = shalt.err (!%p4252_p13)
}
  0x38   : > { %s4365_s24 = smov 256   ;;  %s4366_s25 = smov 16  }
  0x39   : > { %4117 = dma.hbm_to_vmem [thread:$0]  (!%p4445_p11), %s5114_s3, 8192, %s181_s14, [#allocation9], %s4365_s24, %s4365_s24, %s4366_s25  }
  0x3a   : > { %s4479_s29 = sadd.s32 1, %s4356_s18   ;;  %s29_s5 = sadd.s32 1, %s4352_s17 }
  0x3b   : > { %s26_s30 = ssub.s32 %s4356_s18, %s4479_s29  ;;  %p36_p0 = scmp.ne.s32.totalorder %s4352_s17, %s4348_s16 }
  0x3c   : > { %p27_p12 = scmp.eq.s32.totalorder %s26_s30, 0  ;;  %p37_p5 = scmp.eq.s32.totalorder %s4356_s18, 0 }
  0x3d   : > { %p4129_p10 = scmp.lt.s32.totalorder %s4356_s18, 2  ;;  %p5140_p3 = scmp.eq.s32.totalorder %s4417_s19, 1 }
  0x3e   : > { %s4489_s6 = scalar_select %p27_p12, %s4352_s17, %s29_s5  }
  0x3f   : > { %p38_p1 = por %p37_p5, %p36_p0  ;;  %p4493_p2 = por %p5140_p3, %p36_p0 }
  0x40   : > { %s194_s7 = sand.u32 1, %s4352_s17   ;;  %s3737_s8 = sshll.u32 %s4356_s18, 12 }
  0x41   : > { %s5141_s26 = scalar_select %p4493_p2, 1, 0 }
  0x42   : > { %s3688_s9 = sshll.u32 %s194_s7, 8  ;;  %s4502_s12 = scalar_lea.hbm %s5111_s0, %s3737_s8 }
  0x43   : > { %s198_s13 = scalar_lea.vmem [#allocation2], %s3688_s9  ;;  %p4504_p11 = pnand %p4129_p10, %p38_p1 }
  0x44   : > { %s206_s14 = sshll.u32 %s198_s13, 4  ;;  %s4510_s27 = scalar_lea.sflag [#allocation3], %s194_s7  ;;  %s4508_s14 = int_to_ptr.vmem [resolvable:$true] %s206_s14 }
  0x45   : > { %s4256_s28 = scalar_lea.hbm %s4502_s12, 4096  ;;  %p4258_p7 = pneg %p4504_p11 }
  0x46   : > { %p4257_p6 = scmp.ne.s32.totalorder %s4502_s12, %s4256_s28  ;;  %s4261_s8 = scalar_lea.hbm %s5111_s0, 8192 }
  0x47   : > { %p4262_p12 = scmp.lt.s32.totalorder %s4502_s12, %s5111_s0  ;;  %p4263_p0 = scmp.lt.s32.totalorder %s4261_s8, %s4256_s28 }
  0x48   : > { %p4259_p9 = pnand %p4258_p7, %p4257_p6 }
  0x49   : > { %p4264_p5 = por %p4263_p0, %p4262_p12 }
  0x4a   : > { %p4260_p13 = pneg %p4259_p9 }
  0x4c   : > { %p4265_p10 = pnand %p4264_p5, %p4260_p13 }
  0x4e   : > { %4268 = shalt.err (!%p4265_p10)
}
  0x4f   : > { %s4269_s7 = scalar_lea.vmem %s4508_s14, 4096  ;;  %s4367_s11 = smov [#allocation2]  }
  0x50   : > { %p4270_p1 = scmp.ne.s32.totalorder %s4508_s14, %s4269_s7  ;;  %s4274_s13 = sshll.u32 %s4367_s11, 4  ;;  %s4275_s13 = int_to_ptr.vmem [resolvable:$false] %s4274_s13 }
  0x51   : > { %s4276_s30 = scalar_lea.vmem %s4275_s13, 8192  ;;  %p4277_p9 = scmp.lt.s32.totalorder %s4508_s14, %s4275_s13 }
  0x52   : > { %p4272_p3 = pnand %p4270_p1, %p4258_p7  ;;  %p4278_p2 = scmp.lt.s32.totalorder %s4276_s30, %s4269_s7 }
  0x54   : > { %p4273_p6 = pneg %p4272_p3  ;;  %p4279_p4 = por %p4278_p2, %p4277_p9 }
  0x56   : > { %p4280_p8 = pnand %p4279_p4, %p4273_p6 }
  0x58   : > { %4283 = shalt.err (!%p4280_p8)
}
  0x59   : > { %4121 = dma.hbm_to_vmem [thread:$0]  (!%p4504_p11), %s4502_s12, 4096, %s4508_s14, %s4510_s27, %s4365_s24, %s4365_s24, %s4366_s25  }
  0x5a   : > { %p5143_p7 = scmp.ne.s32.totalorder %s5138_s23, 0 }
  0x5c   : > { %218 = sbr.rel (%p5143_p7) target bundleno = 1361 (0x551), region = 36 }
  0x61   : > { %s4537_s28 = sand.u32 1, %s4348_s16   ;;  %p5144_p4 = scmp.ne.s32.totalorder %s5136_s21, 0 }
  0x62   : > { %s3693_s5 = sshll.u32 %s4537_s28, 8  ;;  %s221_s8 = scalar_lea.sflag [#allocation3], %s4537_s28 }
  0x63   : > { %s4543_s20 = scalar_lea.vmem [#allocation2], %s3693_s5 }
  0x64   : > { %4327 = dma.done.wait (%p5144_p4), %s221_s8, 4096  }
  0x65   : > { %4329 = vsyncadd (%p5144_p4), %s221_s8, 4294963200  ;;  %p5145_p8 = scmp.eq.s32.totalorder %s4417_s19, 0 }
  0x67   : > { %4331 = dma.done.wait (%p5145_p8), [#allocation6], 16640   ;;  %p5146_p2 = pmov %p5145_p8 }
  0x69   : > { %4333 = vsyncadd (%p5146_p2), [#allocation6], 4294950656  ;;  %p5147_p11 = pmov %p5146_p2 }
  0x6a   : > { %p5148_p13 = pmov %p5146_p2 }
  0x6b   : > { %4335 = dma.done.wait (%p5147_p11), [#allocation9], 8192  }
  0x6c   : > { %4337 = vsyncadd (%p5148_p13), [#allocation9], 4294959104  ;;  %v356_v0 = vld [vmem:[#allocation7 + $0x1e8] sm:$0xff]  ;;  %v355_v1 = vld [vmem:[#allocation7 + $0x1e0] sm:$0xff]  ;;  %vm1363_vm0 = vcmask 130048   ;;  %s5027_s21 = scalar_lea.vmem [#allocation10], %s3693_s5 }
  0x6d   : > { %v352_v2 = vld [vmem:[#allocation7 + $0x1c8] sm:$0xff]  ;;  %423 = vmatprep.subr.mxu1 %v356_v0  ;;  %v351_v3 = vld [vmem:[#allocation7 + $0x1c0] sm:$0xff]  ;;  %v4558_v24 = vld [vmem:[%s4543_s20 + $0x8] sm:$0xff]  ;;  %s3739_s23 = sshll.u32 %s4417_s19, 12  ;;  %s3580_s24 = sshll.u32 %s5027_s21, 4  ;;  %s5066_s24 = int_to_ptr.vmem [resolvable:$true] %s3580_s24 }
  0x6e   : > { %424 = vmatpush1.msra.mxu1 %v355_v1  ;;  %v348_v4 = vld [vmem:[#allocation7 + $0x1a8] sm:$0xff]  ;;  %v347_v5 = vld [vmem:[#allocation7 + $0x1a0] sm:$0xff]  ;;  %487 = vmatprep.mubr.f32.mxu1 %v4558_v24  ;;  %v4562_v1 = vld [vmem:[%s4543_s20] sm:$0xff]  ;;  %s5064_s14 = scalar_lea.hbm %s5115_s4, %s3739_s23  ;;  %s3566_s27 = scalar_lea.sflag [#allocation4], %s4537_s28 }
  0x6f   : > { %425 = vmatprep.subr.mxu1 %v352_v2  ;;  %v344_v6 = vld [vmem:[#allocation7 + $0x188] sm:$0xff]  ;;  %v343_v7 = vld [vmem:[#allocation7 + $0x180] sm:$0xff]  ;;  %v358_v2 = vld [vmem:[#allocation7 + $0x1f8] sm:$0xff]  ;;  %s4284_s9 = scalar_lea.vmem %s5066_s24, 4096  ;;  %p5165_p0 = scmp.ne.s32.totalorder %s5141_s26, 0 }
  0x70   : > { %426 = vmatpush1.msra.mxu1 %v351_v3  ;;  %v340_v8 = vld [vmem:[#allocation7 + $0x168] sm:$0xff]  ;;  %v339_v9 = vld [vmem:[#allocation7 + $0x160] sm:$0xff]  ;;  %v357_v3 = vld [vmem:[#allocation7 + $0x1f0] sm:$0xff]  ;;  %p4285_p12 = scmp.ne.s32.totalorder %s5066_s24, %s4284_s9  ;;  %s4368_s19 = smov [#allocation10]  }
  0x71   : > { %427 = vmatprep.subr.mxu1 %v348_v4  ;;  %v336_v10 = vld [vmem:[#allocation7 + $0x148] sm:$0xff]  ;;  %v335_v11 = vld [vmem:[#allocation7 + $0x140] sm:$0xff]  ;;  %s4288_s10 = sshll.u32 %s4368_s19, 4  ;;  %s4289_s10 = int_to_ptr.vmem [resolvable:$false] %s4288_s10 }
  0x72   : > { %428 = vmatpush1.msra.mxu1 %v347_v5  ;;  %v332_v12 = vld [vmem:[#allocation7 + $0x128] sm:$0xff]  ;;  %v331_v13 = vld [vmem:[#allocation7 + $0x120] sm:$0xff]  ;;  %v354_v5 = vld [vmem:[#allocation7 + $0x1d8] sm:$0xff]  ;;  %p4286_p5 = pnand %p4285_p12, %p5165_p0  ;;  %s4290_s7 = scalar_lea.vmem %s4289_s10, 8192 }
  0x73   : > { %429 = vmatprep.subr.mxu1 %v344_v6  ;;  %v328_v14 = vld [vmem:[#allocation7 + $0x108] sm:$0xff]  ;;  %v327_v15 = vld [vmem:[#allocation7 + $0x100] sm:$0xff]  ;;  %v353_v6 = vld [vmem:[#allocation7 + $0x1d0] sm:$0xff]  ;;  %p4291_p1 = scmp.lt.s32.totalorder %s5066_s24, %s4289_s10  ;;  %p4292_p3 = scmp.lt.s32.totalorder %s4290_s7, %s4284_s9 }
  0x74   : > { %430 = vmatpush1.msra.mxu1 %v343_v7  ;;  %v324_v16 = vld [vmem:[#allocation7 + $0xe8] sm:$0xff]  ;;  %v323_v17 = vld [vmem:[#allocation7 + $0xe0] sm:$0xff]  ;;  %p4287_p10 = pneg %p4286_p5 }
  0x75   : > { %431 = vmatprep.subr.mxu1 %v340_v8  ;;  %v320_v18 = vld [vmem:[#allocation7 + $0xc8] sm:$0xff]  ;;  %v319_v19 = vld [vmem:[#allocation7 + $0xc0] sm:$0xff]  ;;  %v350_v8 = vld [vmem:[#allocation7 + $0x1b8] sm:$0xff]  ;;  %p4293_p6 = por %p4292_p3, %p4291_p1 }
  0x76   : > { %432 = vmatpush1.msra.mxu1 %v339_v9  ;;  %v316_v20 = vld [vmem:[#allocation7 + $0xa8] sm:$0xff]  ;;  %v315_v21 = vld [vmem:[#allocation7 + $0xa0] sm:$0xff]  ;;  %v349_v9 = vld [vmem:[#allocation7 + $0x1b0] sm:$0xff] }
  0x77   : > { %433 = vmatprep.subr.mxu1 %v336_v10  ;;  %v312_v22 = vld [vmem:[#allocation7 + $0x88] sm:$0xff]  ;;  %v311_v23 = vld [vmem:[#allocation7 + $0x80] sm:$0xff]  ;;  %v4573_v10 = vld [vmem:[%s4543_s20 + $0x28] sm:$0xff]  ;;  %p4294_p9 = pnand %p4293_p6, %p4287_p10 }
  0x78   : > { %434 = vmatpush1.msra.mxu1 %v335_v11  ;;  %v308_v25 = vld [vmem:[#allocation7 + $0x68] sm:$0xff]  ;;  %v307_v26 = vld [vmem:[#allocation7 + $0x60] sm:$0xff]  ;;  %v346_v11 = vld [vmem:[#allocation7 + $0x198] sm:$0xff] }
  0x79   : > { %435 = vmatprep.subr.mxu1 %v332_v12  ;;  %v304_v27 = vld [vmem:[#allocation7 + $0x48] sm:$0xff]  ;;  %v303_v28 = vld [vmem:[#allocation7 + $0x40] sm:$0xff]  ;;  %v345_v12 = vld [vmem:[#allocation7 + $0x190] sm:$0xff] }
  0x7a   : > { %436 = vmatpush1.msra.mxu1 %v331_v13  ;;  %v300_v29 = vld [vmem:[#allocation7 + $0x28] sm:$0xff]  ;;  %v299_v30 = vld [vmem:[#allocation7 + $0x20] sm:$0xff]  ;;  %v4578_v13 = vld [vmem:[%s4543_s20 + $0x20] sm:$0xff] }
  0x7b   : > { %437 = vmatprep.subr.mxu1 %v328_v14  ;;  %v296_v31 = vld [vmem:[#allocation7 + $0x8] sm:$0xff]  ;;  %v295_v32 = vld [vmem:[#allocation7] sm:$0xff]  ;;  %v342_v14 = vld [vmem:[#allocation7 + $0x178] sm:$0xff] }
  0x7c   : > { %438 = vmatpush1.msra.mxu1 %v327_v15  ;;  %v420_v33 = vld [vmem:[#allocation7 + $0x3e8] sm:$0xff]  ;;  %v419_v34 = vld [vmem:[#allocation7 + $0x3e0] sm:$0xff]  ;;  %v341_v15 = vld [vmem:[#allocation7 + $0x170] sm:$0xff] }
  0x7d   : > { %439 = vmatprep.subr.mxu1 %v324_v16  ;;  %v416_v35 = vld [vmem:[#allocation7 + $0x3c8] sm:$0xff]  ;;  %v415_v36 = vld [vmem:[#allocation7 + $0x3c0] sm:$0xff] }
  0x7e   : > { %440 = vmatpush1.msra.mxu1 %v323_v17  ;;  %v412_v37 = vld [vmem:[#allocation7 + $0x3a8] sm:$0xff]  ;;  %v411_v38 = vld [vmem:[#allocation7 + $0x3a0] sm:$0xff]  ;;  %v338_v17 = vld [vmem:[#allocation7 + $0x158] sm:$0xff] }
  0x7f   : > { %441 = vmatprep.subr.mxu1 %v320_v18  ;;  %v408_v39 = vld [vmem:[#allocation7 + $0x388] sm:$0xff]  ;;  %v407_v40 = vld [vmem:[#allocation7 + $0x380] sm:$0xff]  ;;  %v337_v18 = vld [vmem:[#allocation7 + $0x150] sm:$0xff] }
  0x80   : > { %442 = vmatpush1.msra.mxu1 %v319_v19  ;;  %v404_v41 = vld [vmem:[#allocation7 + $0x368] sm:$0xff]  ;;  %v403_v42 = vld [vmem:[#allocation7 + $0x360] sm:$0xff] }
  0x81   : > { %443 = vmatprep.subr.mxu1 %v316_v20  ;;  %v400_v43 = vld [vmem:[#allocation7 + $0x348] sm:$0xff]  ;;  %v399_v44 = vld [vmem:[#allocation7 + $0x340] sm:$0xff]  ;;  %v334_v20 = vld [vmem:[#allocation7 + $0x138] sm:$0xff] }
  0x82   : > { %444 = vmatpush1.msra.mxu1 %v315_v21  ;;  %v396_v45 = vld [vmem:[#allocation7 + $0x328] sm:$0xff]  ;;  %v395_v46 = vld [vmem:[#allocation7 + $0x320] sm:$0xff]  ;;  %v333_v21 = vld [vmem:[#allocation7 + $0x130] sm:$0xff] }
  0x83   : > { %445 = vmatprep.subr.mxu1 %v312_v22  ;;  %v392_v47 = vld [vmem:[#allocation7 + $0x308] sm:$0xff]  ;;  %v391_v48 = vld [vmem:[#allocation7 + $0x300] sm:$0xff]  ;;  %v4589_v22 = vld [vmem:[%s4543_s20 + $0x48] sm:$0xff] }
  0x84   : > { %446 = vmatpush1.msra.mxu1 %v311_v23  ;;  %v388_v49 = vld [vmem:[#allocation7 + $0x2e8] sm:$0xff]  ;;  %v387_v50 = vld [vmem:[#allocation7 + $0x2e0] sm:$0xff]  ;;  %v330_v23 = vld [vmem:[#allocation7 + $0x118] sm:$0xff] }
  0x85   : > { %447 = vmatprep.subr.mxu1 %v308_v25  ;;  %v384_v51 = vld [vmem:[#allocation7 + $0x2c8] sm:$0xff]  ;;  %v383_v52 = vld [vmem:[#allocation7 + $0x2c0] sm:$0xff]  ;;  %v329_v25 = vld [vmem:[#allocation7 + $0x110] sm:$0xff] }
  0x86   : > { %448 = vmatpush1.msra.mxu1 %v307_v26  ;;  %v380_v53 = vld [vmem:[#allocation7 + $0x2a8] sm:$0xff]  ;;  %v379_v54 = vld [vmem:[#allocation7 + $0x2a0] sm:$0xff]  ;;  %v4594_v26 = vld [vmem:[%s4543_s20 + $0x40] sm:$0xff] }
  0x87   : > { %449 = vmatprep.subr.mxu1 %v304_v27  ;;  %v376_v55 = vld [vmem:[#allocation7 + $0x288] sm:$0xff]  ;;  %v375_v56 = vld [vmem:[#allocation7 + $0x280] sm:$0xff]  ;;  %v326_v27 = vld [vmem:[#allocation7 + $0xf8] sm:$0xff] }
  0x88   : > { %450 = vmatpush1.msra.mxu1 %v303_v28  ;;  %v372_v57 = vld [vmem:[#allocation7 + $0x268] sm:$0xff]  ;;  %v371_v58 = vld [vmem:[#allocation7 + $0x260] sm:$0xff]  ;;  %v325_v28 = vld [vmem:[#allocation7 + $0xf0] sm:$0xff] }
  0x89   : > { %451 = vmatprep.subr.mxu1 %v300_v29  ;;  %v368_v59 = vld [vmem:[#allocation7 + $0x248] sm:$0xff]  ;;  %v367_v60 = vld [vmem:[#allocation7 + $0x240] sm:$0xff] }
  0x8a   : > { %452 = vmatpush1.msra.mxu1 %v299_v30  ;;  %v364_v61 = vld [vmem:[#allocation7 + $0x228] sm:$0xff]  ;;  %v363_v62 = vld [vmem:[#allocation7 + $0x220] sm:$0xff]  ;;  %v322_v30 = vld [vmem:[#allocation7 + $0xd8] sm:$0xff] }
  0x8b   : > { %453 = vmatprep.subr.mxu1 %v296_v31  ;;  %v360_v63 = vld [vmem:[#allocation7 + $0x208] sm:$0xff]  ;;  %v359_v0 = vld [vmem:[#allocation7 + $0x200] sm:$0xff]  ;;  %v321_v31 = vld [vmem:[#allocation7 + $0xd0] sm:$0xff] }
  0x8c   : > { %454 = vmatpush1.msra.mxu1 %v295_v32  ;;  %v4565_v4 = vld [vmem:[%s4543_s20 + $0x18] sm:$0xff]  ;;  %v4570_v7 = vld [vmem:[%s4543_s20 + $0x10] sm:$0xff] }
  0x8d   : > { %455 = vmatprep.subr.mxu1 %v420_v33  ;;  %v4581_v16 = vld [vmem:[%s4543_s20 + $0x38] sm:$0xff]  ;;  %v4586_v19 = vld [vmem:[%s4543_s20 + $0x30] sm:$0xff]  ;;  %v318_v33 = vld [vmem:[#allocation7 + $0xb8] sm:$0xff] }
  0x8e   : > { %456 = vmatpush2.msra.mxu1 %v419_v34  ;;  %v4597_v29 = vld [vmem:[%s4543_s20 + $0x58] sm:$0xff]  ;;  %v4602_v32 = vld [vmem:[%s4543_s20 + $0x50] sm:$0xff]  ;;  %v317_v34 = vld [vmem:[#allocation7 + $0xb0] sm:$0xff] }
  0x8f   : > { %457 = vmatprep.subr.mxu1 %v416_v35  ;;  %v4605_v35 = vld [vmem:[%s4543_s20 + $0x68] sm:$0xff] }
  0x90   : > { %458 = vmatpush2.msra.mxu1 %v415_v36  ;;  %5149 = vst [vmem:[#allocation15_spill] sm:$0xff] %v4605_v35  ;;  %v314_v36 = vld [vmem:[#allocation7 + $0x98] sm:$0xff] }
  0x91   : > { %459 = vmatprep.subr.mxu1 %v412_v37  ;;  %v313_v37 = vld [vmem:[#allocation7 + $0x90] sm:$0xff] }
  0x92   : > { %460 = vmatpush2.msra.mxu1 %v411_v38  ;;  %v4610_v38 = vld [vmem:[%s4543_s20 + $0x60] sm:$0xff] }
  0x93   : > { %461 = vmatprep.subr.mxu1 %v408_v39  ;;  %v310_v39 = vld [vmem:[#allocation7 + $0x78] sm:$0xff] }
  0x94   : > { %462 = vmatpush2.msra.mxu1 %v407_v40  ;;  %v309_v40 = vld [vmem:[#allocation7 + $0x70] sm:$0xff] }
  0x95   : > { %463 = vmatprep.subr.mxu1 %v404_v41  ;;  %v4613_v41 = vld [vmem:[%s4543_s20 + $0x78] sm:$0xff] }
  0x96   : > { %464 = vmatpush2.msra.mxu1 %v403_v42  ;;  %v306_v42 = vld [vmem:[#allocation7 + $0x58] sm:$0xff] }
  0x97   : > { %465 = vmatprep.subr.mxu1 %v400_v43  ;;  %v305_v43 = vld [vmem:[#allocation7 + $0x50] sm:$0xff] }
  0x98   : > { %466 = vmatpush2.msra.mxu1 %v399_v44  ;;  %v4618_v44 = vld [vmem:[%s4543_s20 + $0x70] sm:$0xff] }
  0x99   : > { %467 = vmatprep.subr.mxu1 %v396_v45  ;;  %v302_v45 = vld [vmem:[#allocation7 + $0x38] sm:$0xff] }
  0x9a   : > { %468 = vmatpush2.msra.mxu1 %v395_v46  ;;  %v301_v46 = vld [vmem:[#allocation7 + $0x30] sm:$0xff] }
  0x9b   : > { %469 = vmatprep.subr.mxu1 %v392_v47  ;;  %v4621_v47 = vld [vmem:[%s4543_s20 + $0x88] sm:$0xff] }
  0x9c   : > { %470 = vmatpush2.msra.mxu1 %v391_v48  ;;  %5150 = vst [vmem:[#allocation16_spill] sm:$0xff] %v4621_v47  ;;  %v298_v48 = vld [vmem:[#allocation7 + $0x18] sm:$0xff] }
  0x9d   : > { %471 = vmatprep.subr.mxu1 %v388_v49  ;;  %v297_v49 = vld [vmem:[#allocation7 + $0x10] sm:$0xff] }
  0x9e   : > { %472 = vmatpush2.msra.mxu1 %v387_v50  ;;  %v4626_v50 = vld [vmem:[%s4543_s20 + $0x80] sm:$0xff] }
  0x9f   : > { %473 = vmatprep.subr.mxu1 %v384_v51  ;;  %v422_v51 = vld [vmem:[#allocation7 + $0x3f8] sm:$0xff] }
  0xa0   : > { %474 = vmatpush2.msra.mxu1 %v383_v52  ;;  %v421_v52 = vld [vmem:[#allocation7 + $0x3f0] sm:$0xff] }
  0xa1   : > { %475 = vmatprep.subr.mxu1 %v380_v53  ;;  %v4629_v53 = vld [vmem:[%s4543_s20 + $0x98] sm:$0xff] }
  0xa2   : > { %476 = vmatpush2.msra.mxu1 %v379_v54  ;;  %v418_v54 = vld [vmem:[#allocation7 + $0x3d8] sm:$0xff] }
  0xa3   : > { %477 = vmatprep.subr.mxu1 %v376_v55  ;;  %v417_v55 = vld [vmem:[#allocation7 + $0x3d0] sm:$0xff] }
  0xa4   : > { %478 = vmatpush2.msra.mxu1 %v375_v56  ;;  %v4634_v56 = vld [vmem:[%s4543_s20 + $0x90] sm:$0xff] }
  0xa5   : > { %479 = vmatprep.subr.mxu1 %v372_v57  ;;  %v414_v57 = vld [vmem:[#allocation7 + $0x3b8] sm:$0xff] }
  0xa6   : > { %480 = vmatpush2.msra.mxu1 %v371_v58  ;;  %v413_v58 = vld [vmem:[#allocation7 + $0x3b0] sm:$0xff] }
  0xa7   : > { %481 = vmatprep.subr.mxu1 %v368_v59  ;;  %v4637_v59 = vld [vmem:[%s4543_s20 + $0xa8] sm:$0xff] }
  0xa8   : > { %482 = vmatpush2.msra.mxu1 %v367_v60  ;;  %5151 = vst [vmem:[#allocation17_spill] sm:$0xff] %v4637_v59  ;;  %v410_v60 = vld [vmem:[#allocation7 + $0x398] sm:$0xff] }
  0xa9   : > { %483 = vmatprep.subr.mxu1 %v364_v61  ;;  %v409_v61 = vld [vmem:[#allocation7 + $0x390] sm:$0xff] }
  0xaa   : > { %484 = vmatpush2.msra.mxu1 %v363_v62  ;;  %v4642_v62 = vld [vmem:[%s4543_s20 + $0xa0] sm:$0xff] }
  0xab   : > { %485 = vmatprep.subr.mxu1 %v360_v63  ;;  %v406_v63 = vld [vmem:[#allocation7 + $0x378] sm:$0xff] }
  0xac   : > { %486 = vmatpush2.msra.mxu1 %v359_v0  ;;  %v405_v0 = vld [vmem:[#allocation7 + $0x370] sm:$0xff] }
  0xad   : > { %488 = vmatmul.mubr.f32.vlgmr.msra.gmra.mxu1 %v4562_v1  ;;  %584 = vmatprep.subr.mxu1 %v358_v2  ;;  %v4645_v2 = vld [vmem:[%s4543_s20 + $0xb8] sm:$0xff] }
  0xae   : > { %585 = vmatpush1.msra.mxu1 %v357_v3  ;;  %493 = vmatprep.mubr.f32.mxu1 %v4565_v4  ;;  %5152 = vst [vmem:[#allocation18_spill] sm:$0xff] %v4645_v2  ;;  %v402_v3 = vld [vmem:[#allocation7 + $0x358] sm:$0xff] }
  0xaf   : > { %586 = vmatprep.subr.mxu1 %v354_v5  ;;  %v401_v5 = vld [vmem:[#allocation7 + $0x350] sm:$0xff] }
  0xb0   : > { %587 = vmatpush1.msra.mxu1 %v353_v6  ;;  %v4650_v6 = vld [vmem:[%s4543_s20 + $0xb0] sm:$0xff] }
  0xb1   : > { %494 = vmatmul.mubr.f32.gmra.mxu1 %v4570_v7  ;;  %588 = vmatprep.subr.mxu1 %v350_v8  ;;  %v398_v8 = vld [vmem:[#allocation7 + $0x338] sm:$0xff] }
  0xb2   : > { %589 = vmatpush1.msra.mxu1 %v349_v9  ;;  %499 = vmatprep.mubr.f32.mxu1 %v4573_v10  ;;  %v397_v9 = vld [vmem:[#allocation7 + $0x330] sm:$0xff] }
  0xb3   : > { %590 = vmatprep.subr.mxu1 %v346_v11  ;;  %v4653_v11 = vld [vmem:[%s4543_s20 + $0xc8] sm:$0xff] }
  0xb4   : > { %591 = vmatpush1.msra.mxu1 %v345_v12  ;;  %5153 = vst [vmem:[#allocation19_spill] sm:$0xff] %v4653_v11  ;;  %v394_v12 = vld [vmem:[#allocation7 + $0x318] sm:$0xff] }
  0xb5   : > { %500 = vmatmul.mubr.f32.gmra.mxu1 %v4578_v13  ;;  %592 = vmatprep.subr.mxu1 %v342_v14  ;;  %v393_v14 = vld [vmem:[#allocation7 + $0x310] sm:$0xff] }
  0xb6   : > { %593 = vmatpush1.msra.mxu1 %v341_v15  ;;  %505 = vmatprep.mubr.f32.mxu1 %v4581_v16  ;;  %v4658_v15 = vld [vmem:[%s4543_s20 + $0xc0] sm:$0xff] }
  0xb7   : > { %594 = vmatprep.subr.mxu1 %v338_v17  ;;  %v390_v17 = vld [vmem:[#allocation7 + $0x2f8] sm:$0xff] }
  0xb8   : > { %595 = vmatpush1.msra.mxu1 %v337_v18  ;;  %v389_v18 = vld [vmem:[#allocation7 + $0x2f0] sm:$0xff] }
  0xb9   : > { %506 = vmatmul.mubr.f32.gmra.mxu1 %v4586_v19  ;;  %596 = vmatprep.subr.mxu1 %v334_v20  ;;  %v4661_v20 = vld [vmem:[%s4543_s20 + $0xd8] sm:$0xff] }
  0xba   : > { %597 = vmatpush1.msra.mxu1 %v333_v21  ;;  %511 = vmatprep.mubr.f32.mxu1 %v4589_v22  ;;  %5154 = vst [vmem:[#allocation20_spill] sm:$0xff] %v4661_v20  ;;  %v386_v21 = vld [vmem:[#allocation7 + $0x2d8] sm:$0xff] }
  0xbb   : > { %598 = vmatprep.subr.mxu1 %v330_v23  ;;  %v385_v23 = vld [vmem:[#allocation7 + $0x2d0] sm:$0xff] }
  0xbc   : > { %599 = vmatpush1.msra.mxu1 %v329_v25  ;;  %v4666_v25 = vld [vmem:[%s4543_s20 + $0xd0] sm:$0xff] }
  0xbd   : > { %512 = vmatmul.mubr.f32.gmra.mxu1 %v4594_v26  ;;  %600 = vmatprep.subr.mxu1 %v326_v27  ;;  %v382_v27 = vld [vmem:[#allocation7 + $0x2b8] sm:$0xff] }
  0xbe   : > { %601 = vmatpush1.msra.mxu1 %v325_v28  ;;  %517 = vmatprep.mubr.f32.mxu1 %v4597_v29  ;;  %v381_v28 = vld [vmem:[#allocation7 + $0x2b0] sm:$0xff] }
  0xbf   : > { %602 = vmatprep.subr.mxu1 %v322_v30  ;;  %v4669_v30 = vld [vmem:[%s4543_s20 + $0xe8] sm:$0xff] }
  0xc0   : > { %603 = vmatpush1.msra.mxu1 %v321_v31  ;;  %5155 = vst [vmem:[#allocation21_spill] sm:$0xff] %v4669_v30  ;;  %v378_v31 = vld [vmem:[#allocation7 + $0x298] sm:$0xff] }
  0xc1   : > { %518 = vmatmul.mubr.f32.gmra.mxu1 %v4602_v32  ;;  %604 = vmatprep.subr.mxu1 %v318_v33  ;;  %v377_v33 = vld [vmem:[#allocation7 + $0x290] sm:$0xff] }
  0xc2   : > { %605 = vmatpush1.msra.mxu1 %v317_v34  ;;  %523 = vmatprep.mubr.f32.mxu1 %v4605_v35  ;;  %v4674_v34 = vld [vmem:[%s4543_s20 + $0xe0] sm:$0xff] }
  0xc3   : > { %606 = vmatprep.subr.mxu1 %v314_v36  ;;  %v374_v36 = vld [vmem:[#allocation7 + $0x278] sm:$0xff] }
  0xc4   : > { %607 = vmatpush1.msra.mxu1 %v313_v37  ;;  %v373_v37 = vld [vmem:[#allocation7 + $0x270] sm:$0xff] }
  0xc5   : > { %524 = vmatmul.mubr.f32.gmra.mxu1 %v4610_v38  ;;  %608 = vmatprep.subr.mxu1 %v310_v39  ;;  %v4677_v39 = vld [vmem:[%s4543_s20 + $0xf8] sm:$0xff] }
  0xc6   : > { %609 = vmatpush1.msra.mxu1 %v309_v40  ;;  %529 = vmatprep.mubr.f32.mxu1 %v4613_v41  ;;  %5156 = vst [vmem:[#allocation22_spill] sm:$0xff] %v4677_v39  ;;  %v370_v40 = vld [vmem:[#allocation7 + $0x258] sm:$0xff] }
  0xc7   : > { %610 = vmatprep.subr.mxu1 %v306_v42  ;;  %v369_v42 = vld [vmem:[#allocation7 + $0x250] sm:$0xff] }
  0xc8   : > { %611 = vmatpush1.msra.mxu1 %v305_v43  ;;  %v4682_v43 = vld [vmem:[%s4543_s20 + $0xf0] sm:$0xff] }
  0xc9   : > { %530 = vmatmul.mubr.f32.gmra.mxu1 %v4618_v44  ;;  %612 = vmatprep.subr.mxu1 %v302_v45  ;;  %v366_v45 = vld [vmem:[#allocation7 + $0x238] sm:$0xff] }
  0xca   : > { %613 = vmatpush1.msra.mxu1 %v301_v46  ;;  %535 = vmatprep.mubr.f32.mxu1 %v4621_v47  ;;  %v365_v46 = vld [vmem:[#allocation7 + $0x230] sm:$0xff] }
  0xcb   : > { %614 = vmatprep.subr.mxu1 %v298_v48  ;;  %v362_v48 = vld [vmem:[#allocation7 + $0x218] sm:$0xff] }
  0xcc   : > { %615 = vmatpush1.msra.mxu1 %v297_v49  ;;  %v361_v49 = vld [vmem:[#allocation7 + $0x210] sm:$0xff] }
  0xcd   : > { %536 = vmatmul.mubr.f32.gmra.mxu1 %v4626_v50  ;;  %616 = vmatprep.subr.mxu1 %v422_v51 }
  0xce   : > { %617 = vmatpush2.msra.mxu1 %v421_v52  ;;  %541 = vmatprep.mubr.f32.mxu1 %v4629_v53 }
  0xcf   : > { %618 = vmatprep.subr.mxu1 %v418_v54 }
  0xd0   : > { %619 = vmatpush2.msra.mxu1 %v417_v55 }
  0xd1   : > { %542 = vmatmul.mubr.f32.gmra.mxu1 %v4634_v56  ;;  %620 = vmatprep.subr.mxu1 %v414_v57 }
  0xd2   : > { %621 = vmatpush2.msra.mxu1 %v413_v58  ;;  %547 = vmatprep.mubr.f32.mxu1 %v4637_v59 }
  0xd3   : > { %622 = vmatprep.subr.mxu1 %v410_v60 }
  0xd4   : > { %623 = vmatpush2.msra.mxu1 %v409_v61 }
  0xd5   : > { %548 = vmatmul.mubr.f32.gmra.mxu1 %v4642_v62  ;;  %624 = vmatprep.subr.mxu1 %v406_v63 }
  0xd6   : > { %625 = vmatpush2.msra.mxu1 %v405_v0  ;;  %553 = vmatprep.mubr.f32.mxu1 %v4645_v2 }
  0xd7   : > { %626 = vmatprep.subr.mxu1 %v402_v3 }
  0xd8   : > { %627 = vmatpush2.msra.mxu1 %v401_v5 }
  0xd9   : > { %554 = vmatmul.mubr.f32.gmra.mxu1 %v4650_v6  ;;  %628 = vmatprep.subr.mxu1 %v398_v8 }
  0xda   : > { %629 = vmatpush2.msra.mxu1 %v397_v9  ;;  %559 = vmatprep.mubr.f32.mxu1 %v4653_v11 }
  0xdb   : > { %630 = vmatprep.subr.mxu1 %v394_v12 }
  0xdc   : > { %631 = vmatpush2.msra.mxu1 %v393_v14 }
  0xdd   : > { %560 = vmatmul.mubr.f32.gmra.mxu1 %v4658_v15  ;;  %632 = vmatprep.subr.mxu1 %v390_v17 }
  0xde   : > { %633 = vmatpush2.msra.mxu1 %v389_v18  ;;  %565 = vmatprep.mubr.f32.mxu1 %v4661_v20 }
  0xdf   : > { %634 = vmatprep.subr.mxu1 %v386_v21 }
  0xe0   : > { %635 = vmatpush2.msra.mxu1 %v385_v23 }
  0xe1   : > { %566 = vmatmul.mubr.f32.gmra.mxu1 %v4666_v25  ;;  %636 = vmatprep.subr.mxu1 %v382_v27 }
  0xe2   : > { %637 = vmatpush2.msra.mxu1 %v381_v28  ;;  %571 = vmatprep.mubr.f32.mxu1 %v4669_v30 }
  0xe3   : > { %638 = vmatprep.subr.mxu1 %v378_v31 }
  0xe4   : > { %639 = vmatpush2.msra.mxu1 %v377_v33 }
  0xe5   : > { %572 = vmatmul.mubr.f32.gmra.mxu1 %v4674_v34  ;;  %640 = vmatprep.subr.mxu1 %v374_v36 }
  0xe6   : > { %641 = vmatpush2.msra.mxu1 %v373_v37  ;;  %577 = vmatprep.mubr.f32.mxu1 %v4677_v39 }
  0xe7   : > { %642 = vmatprep.subr.mxu1 %v370_v40 }
  0xe8   : > { %643 = vmatpush2.msra.mxu1 %v369_v42 }
  0xe9   : > { %578 = vmatmul.mubr.f32.gmra.mxu1 %v4682_v43  ;;  %644 = vmatprep.subr.mxu1 %v366_v45 }
  0xea   : > { %645 = vmatpush2.msra.mxu1 %v365_v46  ;;  %648 = vmatprep.mubr.f32.mxu1 %v4558_v24 }
  0xeb   : > { %646 = vmatprep.subr.mxu1 %v362_v48 }
  0xec   : > { %647 = vmatpush2.msra.mxu1 %v361_v49 }
  0xed   : > { %649 = vmatmul.mubr.f32.vlgmr.msra.gmra.mxu1 %v4562_v1  ;;  %3931 = vmatprep.subr.mxu1 %v4586_v19 }
  0xee   : > { %654 = vmatprep.mubr.f32.mxu1 %v4565_v4  ;;  %3932 = vmatpush3.msra.mxu1 %v4586_v19 }
  0xef   : > { %3933 = vmatprep.subr.mxu1 %v4578_v13 }
  0xf0   : > { %3934 = vmatpush3.msra.mxu1 %v4578_v13 }
  0xf1   : > { %655 = vmatmul.mubr.f32.gmra.mxu1 %v4570_v7  ;;  %3945 = vmatprep.subr.mxu1 %v4618_v44 }
  0xf2   : > { %660 = vmatprep.mubr.f32.mxu1 %v4573_v10 }
  0xf5   : > { %661 = vmatmul.mubr.f32.gmra.mxu1 %v4578_v13 }
  0xf6   : > { %666 = vmatprep.mubr.f32.mxu1 %v4581_v16 }
  0xf9   : > { %667 = vmatmul.mubr.f32.gmra.mxu1 %v4586_v19 }
  0xfa   : > { %672 = vmatprep.mubr.f32.mxu1 %v4589_v22 }
  0xfd   : > { %673 = vmatmul.mubr.f32.gmra.mxu1 %v4594_v26 }
  0xfe   : > { %678 = vmatprep.mubr.f32.mxu1 %v4597_v29 }
 0x101   : > { %679 = vmatmul.mubr.f32.gmra.mxu1 %v4602_v32 }
 0x102   : > { %684 = vmatprep.mubr.f32.mxu1 %v4605_v35 }
 0x105   : > { %685 = vmatmul.mubr.f32.gmra.mxu1 %v4610_v38 }
 0x106   : > { %690 = vmatprep.mubr.f32.mxu1 %v4613_v41 }
 0x109   : > { %691 = vmatmul.mubr.f32.gmra.mxu1 %v4618_v44 }
 0x10a   : > { %696 = vmatprep.mubr.f32.mxu1 %v4621_v47 }
 0x10d   : > { %697 = vmatmul.mubr.f32.gmra.mxu1 %v4626_v50 }
 0x10e   : > { %702 = vmatprep.mubr.f32.mxu1 %v4629_v53 }
 0x111   : > { %703 = vmatmul.mubr.f32.gmra.mxu1 %v4634_v56 }
 0x112   : > { %708 = vmatprep.mubr.f32.mxu1 %v4637_v59 }
 0x115   : > { %709 = vmatmul.mubr.f32.gmra.mxu1 %v4642_v62 }
 0x116   : > { %714 = vmatprep.mubr.f32.mxu1 %v4645_v2 }
 0x119   : > { %715 = vmatmul.mubr.f32.gmra.mxu1 %v4650_v6 }
 0x11a   : > { %720 = vmatprep.mubr.f32.mxu1 %v4653_v11 }
 0x11d   : > { %721 = vmatmul.mubr.f32.gmra.mxu1 %v4658_v15 }
 0x11e   : > { %726 = vmatprep.mubr.f32.mxu1 %v4661_v20 }
 0x121   : > { %727 = vmatmul.mubr.f32.gmra.mxu1 %v4666_v25 }
 0x122   : > { %732 = vmatprep.mubr.f32.mxu1 %v4669_v30 }
 0x125   : > { %733 = vmatmul.mubr.f32.gmra.mxu1 %v4674_v34 }
 0x126   : > { %738 = vmatprep.mubr.f32.mxu1 %v4677_v39 }
 0x129   : > { %739 = vmatmul.mubr.f32.gmra.mxu1 %v4682_v43 }
 0x16d   : > { %v489_v24 = vpop.f32.mrf.mxu1 }
 0x16e   : > { %3872 = vmatprep.mubr.f32.mxu0 %v489_v24 }
 0x16f   : > { %v4722_v13 = vpop.f32.mrf.mxu1 }
 0x171   : > { %v495_v19 = vpop.f32.mrf.mxu1 }
 0x173   : > { %v4724_v51 = vpop.f32.mrf.mxu1 }
 0x175   : > { %v501_v52 = vpop.f32.mrf.mxu1 }
 0x177   : > { %v4726_v54 = vpop.f32.mrf.mxu1 }
 0x179   : > { %v507_v55 = vpop.f32.mrf.mxu1 }
 0x17b   : > { %v4728_v57 = vpop.f32.mrf.mxu1 }
 0x17d   : > { %v513_v58 = vpop.f32.mrf.mxu1 }
 0x17f   : > { %v4730_v60 = vpop.f32.mrf.mxu1 }
 0x181   : > { %v519_v61 = vpop.f32.mrf.mxu1 }
 0x183   : > { %v4732_v63 = vpop.f32.mrf.mxu1 }
 0x185   : > { %v525_v0 = vpop.f32.mrf.mxu1 }
 0x187   : > { %v4734_v3 = vpop.f32.mrf.mxu1 }
 0x189   : > { %v531_v5 = vpop.f32.mrf.mxu1 }
 0x18b   : > { %v4736_v8 = vpop.f32.mrf.mxu1 }
 0x18d   : > { %v537_v9 = vpop.f32.mrf.mxu1 }
 0x18f   : > { %v4738_v12 = vpop.f32.mrf.mxu1 }
 0x191   : > { %v4740_v14 = vpop.f32.mrf.mxu1 }
 0x193   : > { %v4742_v17 = vpop.f32.mrf.mxu1 }
 0x195   : > { %v4744_v18 = vpop.f32.mrf.mxu1 }
 0x197   : > { %v4746_v21 = vpop.f32.mrf.mxu1 }
 0x199   : > { %v4748_v23 = vpop.f32.mrf.mxu1 }
 0x19b   : > { %v4750_v27 = vpop.f32.mrf.mxu1 }
 0x19d   : > { %v4752_v28 = vpop.f32.mrf.mxu1 }
 0x19f   : > { %v4754_v31 = vpop.f32.mrf.mxu1 }
 0x1a1   : > { %v4756_v33 = vpop.f32.mrf.mxu1 }
 0x1a3   : > { %v4758_v36 = vpop.f32.mrf.mxu1 }
 0x1a5   : > { %v4760_v37 = vpop.f32.mrf.mxu1 }
 0x1a7   : > { %v4762_v40 = vpop.f32.mrf.mxu1 }
 0x1a9   : > { %v4764_v42 = vpop.f32.mrf.mxu1 }
 0x1ab   : > { %v4766_v45 = vpop.f32.mrf.mxu1 }
 0x1ad   : > { %v650_v46 = vpop.f32.mrf.mxu1 }
 0x1af   : > { %v4768_v48 = vpop.f32.mrf.mxu1 }
 0x1b1   : > { %v656_v49 = vpop.f32.mrf.mxu1 }
 0x1b2   : > { %3868 = vmatprep.subr.mxu0 %v656_v49 }
 0x1b3   : > { %v4770_v24 = vpop.f32.mrf.mxu1  ;;  %3869 = vmatpush3.xpose.msra.mxu0 %v656_v49 }
 0x1b4   : > { %3870 = vmatprep.subr.mxu0 %v650_v46 }
 0x1b5   : > { %v662_v30 = vpop.f32.mrf.mxu1 }
 0x1b7   : > { %v4772_v39 = vpop.f32.mrf.mxu1  ;;  %3871 = vmatpush3.xpose.msra.mxu0 %v650_v46 }
 0x1b9   : > { %v668_v11 = vpop.f32.mrf.mxu1 }
 0x1ba   : > { %3873 = vmatmul.mubr.f32.vlgmr.msra.gmra.mxu0 %v495_v19  ;;  %3875 = vmatprep.subr.mxu0 %v668_v11 }
 0x1bb   : > { %v4774_v59 = vpop.f32.mrf.mxu1  ;;  %3876 = vmatpush3.xpose.msra.mxu0 %v668_v11  ;;  %3879 = vmatprep.mubr.f32.mxu0 %v501_v52 }
 0x1bc   : > { %3877 = vmatprep.subr.mxu0 %v662_v30 }
 0x1bd   : > { %v674_v20 = vpop.f32.mrf.mxu1 }
 0x1bf   : > { %v4776_v2 = vpop.f32.mrf.mxu1  ;;  %3878 = vmatpush3.xpose.msra.mxu0 %v662_v30 }
 0x1c1   : > { %v680_v47 = vpop.f32.mrf.mxu1 }
 0x1c2   : > { %3880 = vmatmul.mubr.f32.vlgmr.msra.gmra.mxu0 %v507_v55  ;;  %3882 = vmatprep.subr.mxu0 %v680_v47 }
 0x1c3   : > { %v4778_v49 = vpop.f32.mrf.mxu1  ;;  %3883 = vmatpush3.xpose.msra.mxu0 %v680_v47  ;;  %3886 = vmatprep.mubr.f32.mxu0 %v513_v58 }
 0x1c4   : > { %3884 = vmatprep.subr.mxu0 %v674_v20 }
 0x1c5   : > { %v686_v46 = vpop.f32.mrf.mxu1 }
 0x1c7   : > { %v4780_v19 = vpop.f32.mrf.mxu1  ;;  %3885 = vmatpush3.xpose.msra.mxu0 %v674_v20 }
 0x1c9   : > { %v692_v35 = vpop.f32.mrf.mxu1 }
 0x1ca   : > { %3887 = vmatmul.mubr.f32.vlgmr.msra.gmra.mxu0 %v519_v61  ;;  %3889 = vmatprep.subr.mxu0 %v692_v35 }
 0x1cb   : > { %v4782_v11 = vpop.f32.mrf.mxu1  ;;  %3890 = vmatpush3.xpose.msra.mxu0 %v692_v35  ;;  %3893 = vmatprep.mubr.f32.mxu0 %v525_v0 }
 0x1cc   : > { %3891 = vmatprep.subr.mxu0 %v686_v46 }
 0x1cd   : > { %v698_v30 = vpop.f32.mrf.mxu1 }
 0x1cf   : > { %v4784_v52 = vpop.f32.mrf.mxu1  ;;  %3892 = vmatpush3.xpose.msra.mxu0 %v686_v46 }
 0x1d1   : > { %v704_v55 = vpop.f32.mrf.mxu1 }
 0x1d2   : > { %3894 = vmatmul.mubr.f32.vlgmr.msra.gmra.mxu0 %v531_v5  ;;  %3896 = vmatprep.subr.mxu0 %v704_v55 }
 0x1d3   : > { %v4786_v47 = vpop.f32.mrf.mxu1  ;;  %3897 = vmatpush3.xpose.msra.mxu0 %v704_v55  ;;  %3900 = vmatprep.mubr.f32.mxu0 %v537_v9 }
 0x1d4   : > { %3898 = vmatprep.subr.mxu0 %v698_v30 }
 0x1d5   : > { %v710_v20 = vpop.f32.mrf.mxu1 }
 0x1d7   : > { %v4788_v58 = vpop.f32.mrf.mxu1  ;;  %3899 = vmatpush3.xpose.msra.mxu0 %v698_v30 }
 0x1d9   : > { %v716_v61 = vpop.f32.mrf.mxu1 }
 0x1da   : > { %3901 = vmatmul.mubr.f32.vlgmr.msra.gmra.mxu0 %v4740_v14  ;;  %3903 = vmatprep.subr.mxu0 %v716_v61 }
 0x1db   : > { %v4791_v35 = vpop.f32.mrf.mxu1  ;;  %3904 = vmatpush3.xpose.msra.mxu0 %v716_v61  ;;  %3907 = vmatprep.mubr.f32.mxu0 %v4744_v18 }
 0x1dc   : > { %3905 = vmatprep.subr.mxu0 %v710_v20 }
 0x1dd   : > { %v722_v0 = vpop.f32.mrf.mxu1 }
 0x1df   : > { %v4794_v5 = vpop.f32.mrf.mxu1  ;;  %3906 = vmatpush3.xpose.msra.mxu0 %v710_v20 }
 0x1e1   : > { %v728_v9 = vpop.f32.mrf.mxu1 }
 0x1e2   : > { %3908 = vmatmul.mubr.f32.vlgmr.msra.gmra.mxu0 %v4748_v23  ;;  %3910 = vmatprep.subr.mxu0 %v728_v9 }
 0x1e3   : > { %v4797_v46 = vpop.f32.mrf.mxu1  ;;  %3911 = vmatpush3.xpose.msra.mxu0 %v728_v9  ;;  %3914 = vmatprep.mubr.f32.mxu0 %v4752_v28  ;;  %v4810_v28 = vld [vmem:[#allocation5] sm:$0xff] }
 0x1e4   : > { %3912 = vmatprep.subr.mxu0 %v722_v0 }
 0x1e5   : > { %v734_v14 = vpop.f32.mrf.mxu1 }
 0x1e7   : > { %v4800_v30 = vpop.f32.mrf.mxu1  ;;  %3913 = vmatpush3.xpose.msra.mxu0 %v722_v0 }
 0x1e9   : > { %v740_v18 = vpop.f32.mrf.mxu1 }
 0x1ea   : > { %3915 = vmatmul.mubr.f32.vlgmr.msra.gmra.mxu0 %v4756_v33  ;;  %3917 = vmatprep.subr.mxu0 %v740_v18  ;;  %v4812_v33 = vld [vmem:[#allocation5 + $0x8] sm:$0xff] }
 0x1eb   : > { %3918 = vmatpush3.xpose.msra.mxu0 %v740_v18  ;;  %3921 = vmatprep.mubr.f32.mxu0 %v4760_v37 }
 0x1ec   : > { %3919 = vmatprep.subr.mxu0 %v734_v14 }
 0x1ef   : > { %3920 = vmatpush3.xpose.msra.mxu0 %v734_v14 }
 0x1f0   : > { %3924 = vmatprep.subr.mxu0 %v4570_v7 }
 0x1f2   : > { %3922 = vmatmul.mubr.f32.vlgmr.msra.gmra.mxu0 %v4764_v42 }
 0x1f3   : > { %3925 = vmatpush3.msra.mxu0 %v4570_v7 }
 0x1f4   : > { %3926 = vmatprep.subr.mxu0 %v4562_v1 }
 0x1f5   : > { %3927 = vmatpush3.msra.mxu0 %v4562_v1 }
 0x1f6   : > { %3938 = vmatprep.subr.mxu0 %v4602_v32 }
 0x27a   : > { %v3874_v23 = vpop.f32.mrf.mxu0 }
 0x27b   : > { %v1348_v20 = vmul.f32 %v3874_v23, %v4812_v33 }
 0x27c   : > { %v813_v37 = vpop.f32.mrf.mxu0 }
 0x27d   : > { %v1347_v55 = vmul.f32 %v813_v37, %v4810_v28 }
 0x27f   : > { %3928 = vmatprep.mubr.msk.f32.mxu0 %vm1363_vm0, %v1347_v55 }
 0x280   : > { %3929 = vmatmul.mubr.msk.f32.vlgmr.msra.gmra.mxu0 %vm1363_vm0, %v1348_v20 }
 0x281   : > { %3939 = vmatpush3.msra.mxu0 %v4602_v32 }
 0x282   : > { %v3881_v1 = vpop.f32.mrf.mxu0  ;;  %3940 = vmatprep.subr.mxu0 %v4594_v26 }
 0x283   : > { %3941 = vmatpush3.msra.mxu0 %v4594_v26  ;;  %v1350_v61 = vmul.f32 %v3881_v1, %v4812_v33 }
 0x284   : > { %v888_v7 = vpop.f32.mrf.mxu0  ;;  %3952 = vmatprep.subr.mxu0 %v4634_v56 }
 0x285   : > { %v1349_v42 = vmul.f32 %v888_v7, %v4810_v28 }
 0x287   : > { %3935 = vmatprep.mubr.msk.f32.mxu1 %vm1363_vm0, %v1349_v42 }
 0x288   : > { %3936 = vmatmul.mubr.msk.f32.vlgmr.msra.gmra.mxu1 %vm1363_vm0, %v1350_v61 }
 0x289   : > { %3946 = vmatpush3.msra.mxu1 %v4618_v44 }
 0x28a   : > { %v3888_v0 = vpop.f32.mrf.mxu0  ;;  %3947 = vmatprep.subr.mxu1 %v4610_v38 }
 0x28b   : > { %3948 = vmatpush3.msra.mxu1 %v4610_v38  ;;  %v1352_v9 = vmul.f32 %v3888_v0, %v4812_v33  ;;  %v5160_v0 = vld [vmem:[#allocation20_spill] sm:$0xff] }
 0x28c   : > { %v963_v32 = vpop.f32.mrf.mxu0  ;;  %3959 = vmatprep.subr.mxu1 %v4650_v6 }
 0x28d   : > { %v1351_v26 = vmul.f32 %v963_v32, %v4810_v28 }
 0x28f   : > { %3942 = vmatprep.mubr.msk.f32.mxu0 %vm1363_vm0, %v1351_v26 }
 0x290   : > { %3943 = vmatmul.mubr.msk.f32.vlgmr.msra.gmra.mxu0 %vm1363_vm0, %v1352_v9 }
 0x291   : > { %3953 = vmatpush3.msra.mxu0 %v4634_v56 }
 0x292   : > { %v3895_v14 = vpop.f32.mrf.mxu0  ;;  %3954 = vmatprep.subr.mxu0 %v4626_v50 }
 0x293   : > { %3955 = vmatpush3.msra.mxu0 %v4626_v50  ;;  %v1354_v18 = vmul.f32 %v3895_v14, %v4812_v33 }
 0x294   : > { %v1038_v44 = vpop.f32.mrf.mxu0  ;;  %3966 = vmatprep.subr.mxu0 %v4666_v25 }
 0x295   : > { %v1353_v38 = vmul.f32 %v1038_v44, %v4810_v28  ;;  %v5161_v44 = vld [vmem:[#allocation17_spill] sm:$0xff] }
 0x297   : > { %3949 = vmatprep.mubr.msk.f32.mxu1 %vm1363_vm0, %v1353_v38  ;;  %v3339_v38 = vld [vmem:[#allocation8 + $0xf8] sm:$0xff] }
 0x298   : > { %3950 = vmatmul.mubr.msk.f32.vlgmr.msra.gmra.mxu1 %vm1363_vm0, %v1354_v18 }
 0x299   : > { %3960 = vmatpush3.msra.mxu1 %v4650_v6 }
 0x29a   : > { %v3902_v23 = vpop.f32.mrf.mxu0  ;;  %3961 = vmatprep.subr.mxu1 %v4642_v62 }
 0x29b   : > { %3962 = vmatpush3.msra.mxu1 %v4642_v62  ;;  %v1356_v37 = vmul.f32 %v3902_v23, %v4812_v33  ;;  %v5162_v23 = vld [vmem:[#allocation19_spill] sm:$0xff] }
 0x29c   : > { %v1113_v56 = vpop.f32.mrf.mxu0  ;;  %3973 = vmatprep.subr.mxu1 %v4682_v43 }
 0x29d   : > { %v1355_v50 = vmul.f32 %v1113_v56, %v4810_v28 }
 0x29f   : > { %3956 = vmatprep.mubr.msk.f32.mxu0 %vm1363_vm0, %v1355_v50  ;;  %v5163_v50 = vld [vmem:[#allocation22_spill] sm:$0xff] }
 0x2a0   : > { %3957 = vmatmul.mubr.msk.f32.vlgmr.msra.gmra.mxu0 %vm1363_vm0, %v1356_v37 }
 0x2a1   : > { %3967 = vmatpush3.msra.mxu0 %v4666_v25 }
 0x2a2   : > { %3968 = vmatprep.subr.mxu0 %v4658_v15  ;;  %v3909_v6 = vpop.f32.mrf.mxu0 }
 0x2a3   : > { %3969 = vmatpush3.msra.mxu0 %v4658_v15  ;;  %v1358_v20 = vmul.f32 %v3909_v6, %v4812_v33 }
 0x2a4   : > { %3980 = vmatprep.subr.mxu0 %v4770_v24  ;;  %v1188_v62 = vpop.f32.mrf.mxu0 }
 0x2a5   : > { %v1357_v55 = vmul.f32 %v1188_v62, %v4810_v28 }
 0x2a7   : > { %3963 = vmatprep.mubr.msk.f32.mxu1 %vm1363_vm0, %v1357_v55 }
 0x2a8   : > { %3964 = vmatmul.mubr.msk.f32.vlgmr.msra.gmra.mxu1 %vm1363_vm0, %v1358_v20 }
 0x2a9   : > { %3974 = vmatpush3.msra.mxu1 %v4682_v43 }
 0x2aa   : > { %3975 = vmatprep.subr.mxu1 %v4674_v34  ;;  %v3916_v25 = vpop.f32.mrf.mxu0 }
 0x2ab   : > { %3976 = vmatpush3.msra.mxu1 %v4674_v34  ;;  %v1360_v7 = vmul.f32 %v3916_v25, %v4812_v33  ;;  %v3338_v25 = vld [vmem:[#allocation8 + $0xf0] sm:$0xff] }
 0x2ac   : > { %3987 = vmatprep.subr.mxu1 %v4774_v59  ;;  %v1263_v15 = vpop.f32.mrf.mxu0 }
 0x2ad   : > { %v1359_v1 = vmul.f32 %v1263_v15, %v4810_v28  ;;  %v3337_v15 = vld [vmem:[#allocation8 + $0xe8] sm:$0xff] }
 0x2af   : > { %3970 = vmatprep.mubr.msk.f32.mxu0 %vm1363_vm0, %v1359_v1  ;;  %v3336_v1 = vld [vmem:[#allocation8 + $0xe0] sm:$0xff] }
 0x2b0   : > { %3971 = vmatmul.mubr.msk.f32.vlgmr.msra.gmra.mxu0 %vm1363_vm0, %v1360_v7 }
 0x2b1   : > { %3981 = vmatpush3.xpose.msra.mxu0 %v4770_v24  ;;  %3984 = vmatprep.mubr.f32.mxu0 %v4722_v13 }
 0x2b2   : > { %3982 = vmatprep.subr.mxu0 %v4768_v48  ;;  %v3923_v43 = vpop.f32.mrf.mxu0 }
 0x2b3   : > { %v1362_v61 = vmul.f32 %v3923_v43, %v4812_v33  ;;  %v5164_v43 = vld [vmem:[#allocation21_spill] sm:$0xff] }
 0x2b4   : > { %v1338_v42 = vpop.f32.mrf.mxu0 }
 0x2b5   : > { %v1361_v34 = vmul.f32 %v1338_v42, %v4810_v28  ;;  %3983 = vmatpush3.xpose.msra.mxu0 %v4768_v48  ;;  %v3335_v42 = vld [vmem:[#allocation8 + $0xd8] sm:$0xff] }
 0x2b6   : > { %3994 = vmatprep.subr.mxu0 %v4778_v49 }
 0x2b7   : > { %3977 = vmatprep.mubr.msk.f32.mxu1 %vm1363_vm0, %v1361_v34  ;;  %v3334_v34 = vld [vmem:[#allocation8 + $0xd0] sm:$0xff] }
 0x2b8   : > { %3985 = vmatmul.mubr.f32.vlgmr.msra.gmra.mxu0 %v4724_v51  ;;  %3978 = vmatmul.mubr.msk.f32.vlgmr.msra.gmra.mxu1 %vm1363_vm0, %v1362_v61 }
 0x2b9   : > { %3988 = vmatpush3.xpose.msra.mxu1 %v4774_v59  ;;  %3995 = vmatpush3.xpose.msra.mxu0 %v4778_v49  ;;  %v742_v59 = vpop.f32.mrf.mxu1 }
 0x2ba   : > { %3998 = vmatprep.mubr.f32.mxu0 %v4730_v60  ;;  %3989 = vmatprep.subr.mxu1 %v4772_v39 }
 0x2bb   : > { %3991 = vmatprep.mubr.f32.mxu1 %v4726_v54  ;;  %3996 = vmatprep.subr.mxu0 %v4776_v2 }
 0x2bd   : > { %3990 = vmatpush3.xpose.msra.mxu1 %v4772_v39  ;;  %3997 = vmatpush3.xpose.msra.mxu0 %v4776_v2  ;;  %v4177_v2 = vld [vmem:[%s4543_s20 + $0x8] sm:$0xff] }
 0x2be   : > { %4001 = vmatprep.subr.mxu1 %v4782_v11  ;;  %4008 = vmatprep.subr.mxu0 %v4786_v47 }
 0x2c0   : > { %3992 = vmatmul.mubr.f32.vlgmr.msra.gmra.mxu1 %v4728_v57  ;;  %3999 = vmatmul.mubr.f32.vlgmr.msra.gmra.mxu0 %v4732_v63 }
 0x2c1   : > { %4002 = vmatpush3.xpose.msra.mxu1 %v4782_v11  ;;  %4005 = vmatprep.mubr.f32.mxu1 %v4734_v3 }
 0x2c2   : > { %4009 = vmatpush3.xpose.msra.mxu0 %v4786_v47  ;;  %4012 = vmatprep.mubr.f32.mxu0 %v4738_v12 }
 0x2c3   : > { %4003 = vmatprep.subr.mxu1 %v4780_v19  ;;  %4010 = vmatprep.subr.mxu0 %v4784_v52 }
 0x2c5   : > { %4004 = vmatpush3.xpose.msra.mxu1 %v4780_v19 }
 0x2c6   : > { %4011 = vmatpush3.xpose.msra.mxu0 %v4784_v52  ;;  %4015 = vmatprep.subr.mxu1 %v4791_v35 }
 0x2c7   : > { %4022 = vmatprep.subr.mxu0 %v4797_v46 }
 0x2c8   : > { %4006 = vmatmul.mubr.f32.vlgmr.msra.gmra.mxu1 %v4736_v8 }
 0x2c9   : > { %4013 = vmatmul.mubr.f32.vlgmr.msra.gmra.mxu0 %v4742_v17  ;;  %4016 = vmatpush3.xpose.msra.mxu1 %v4791_v35  ;;  %v5158_v35 = vld [vmem:[#allocation16_spill] sm:$0xff] }
 0x2ca   : > { %4019 = vmatprep.mubr.f32.mxu1 %v4746_v21  ;;  %4023 = vmatpush3.xpose.msra.mxu0 %v4797_v46 }
 0x2cb   : > { %4026 = vmatprep.mubr.f32.mxu0 %v4754_v31  ;;  %4017 = vmatprep.subr.mxu1 %v4788_v58 }
 0x2cc   : > { %4024 = vmatprep.subr.mxu0 %v4794_v5 }
 0x2cd   : > { %4018 = vmatpush3.xpose.msra.mxu1 %v4788_v58 }
 0x2ce   : > { %4025 = vmatpush3.xpose.msra.mxu0 %v4794_v5  ;;  %4029 = vmatprep.subr.mxu1 %v742_v59 }
 0x2cf   : > { %4036 = vmatprep.subr.mxu0 %v4565_v4 }
 0x2d0   : > { %4020 = vmatmul.mubr.f32.vlgmr.msra.gmra.mxu1 %v4750_v27 }
 0x2d1   : > { %4027 = vmatmul.mubr.f32.vlgmr.msra.gmra.mxu0 %v4758_v36  ;;  %4030 = vmatpush3.xpose.msra.mxu1 %v742_v59  ;;  %v3333_v59 = vld [vmem:[#allocation8 + $0xc8] sm:$0xff] }
 0x2d2   : > { %4033 = vmatprep.mubr.f32.mxu1 %v4762_v40  ;;  %4031 = vmatprep.subr.mxu1 %v4800_v30 }
 0x2d3   : > { %4037 = vmatpush3.msra.mxu0 %v4565_v4 }
 0x2d4   : > { %4038 = vmatprep.subr.mxu0 %v4177_v2 }
 0x2d5   : > { %4032 = vmatpush3.xpose.msra.mxu1 %v4800_v30  ;;  %4039 = vmatpush3.msra.mxu0 %v4177_v2  ;;  %v5159_v30 = vld [vmem:[#allocation18_spill] sm:$0xff] }
 0x2d6   : > { %4043 = vmatprep.subr.mxu1 %v4581_v16  ;;  %4050 = vmatprep.subr.mxu0 %v4597_v29 }
 0x2d8   : > { %4034 = vmatmul.mubr.f32.vlgmr.msra.gmra.mxu1 %v4766_v45 }
 0x2d9   : > { %4044 = vmatpush3.msra.mxu1 %v4581_v16 }
 0x2da   : > { %4045 = vmatprep.subr.mxu1 %v4573_v10 }
 0x2db   : > { %4046 = vmatpush3.msra.mxu1 %v4573_v10 }
 0x2dc   : > { %4057 = vmatprep.subr.mxu1 %v4613_v41 }
 0x340   : > { %v4923_v4 = vpop.f32.mrf.mxu0 }
 0x342   : > { %v4925_v39 = vpop.f32.mrf.mxu0 }
 0x348   : > { %v4929_v51 = vpop.f32.mrf.mxu1 }
 0x34a   : > { %v4933_v57 = vpop.f32.mrf.mxu1 }
 0x350   : > { %v4927_v13 = vpop.f32.mrf.mxu0 }
 0x352   : > { %v4931_v54 = vpop.f32.mrf.mxu0 }
 0x358   : > { %v4937_v16 = vpop.f32.mrf.mxu1 }
 0x35a   : > { %v4941_v10 = vpop.f32.mrf.mxu1 }
 0x360   : > { %v4935_v60 = vpop.f32.mrf.mxu0 }
 0x362   : > { %v4939_v63 = vpop.f32.mrf.mxu0 }
 0x368   : > { %v4945_v8 = vpop.f32.mrf.mxu1 }
 0x36a   : > { %v4949_v17 = vpop.f32.mrf.mxu1 }
 0x370   : > { %v4943_v3 = vpop.f32.mrf.mxu0 }
 0x372   : > { %v4947_v12 = vpop.f32.mrf.mxu0 }
 0x378   : > { %v3986_v21 = vpop.f32.mrf.mxu0  ;;  %v4951_v27 = vpop.f32.mrf.mxu1 }
 0x379   : > { %v2613_v40 = vmul.f32 %v3986_v21, %v4812_v33  ;;  %v3332_v21 = vld [vmem:[#allocation8 + $0xc0] sm:$0xff] }
 0x37a   : > { %v2078_v31 = vpop.f32.mrf.mxu0  ;;  %v4956_v45 = vpop.f32.mrf.mxu1 }
 0x37b   : > { %v2612_v36 = vmul.f32 %v2078_v31, %v4810_v28 }
 0x37d   : > { %4040 = vmatprep.mubr.msk.f32.mxu0 %vm1363_vm0, %v2612_v36  ;;  %v3331_v36 = vld [vmem:[#allocation8 + $0xb8] sm:$0xff] }
 0x37e   : > { %4041 = vmatmul.mubr.msk.f32.vlgmr.msra.gmra.mxu0 %vm1363_vm0, %v2613_v40  ;;  %v3330_v40 = vld [vmem:[#allocation8 + $0xb0] sm:$0xff] }
 0x37f   : > { %4051 = vmatpush3.msra.mxu0 %v4597_v29  ;;  %v5157_v29 = vld [vmem:[#allocation15_spill] sm:$0xff] }
 0x380   : > { %v3993_v48 = vpop.f32.mrf.mxu1  ;;  %v4000_v24 = vpop.f32.mrf.mxu0  ;;  %4052 = vmatprep.subr.mxu0 %v4589_v22 }
 0x381   : > { %4053 = vmatpush3.msra.mxu0 %v4589_v22  ;;  %v2615_v47 = vmul.f32 %v3993_v48, %v4812_v33  ;;  %v2617_v58 = vmul.f32 %v4000_v24, %v4812_v33  ;;  %v3329_v48 = vld [vmem:[#allocation8 + $0xa8] sm:$0xff]  ;;  %v3328_v24 = vld [vmem:[#allocation8 + $0xa0] sm:$0xff] }
 0x382   : > { %v2153_v49 = vpop.f32.mrf.mxu1  ;;  %v2228_v19 = vpop.f32.mrf.mxu0  ;;  %4064 = vmatprep.subr.mxu0 %v4629_v53 }
 0x383   : > { %v2614_v11 = vmul.f32 %v2153_v49, %v4810_v28  ;;  %v2616_v52 = vmul.f32 %v2228_v19, %v4810_v28  ;;  %v3327_v49 = vld [vmem:[#allocation8 + $0x98] sm:$0xff]  ;;  %v3325_v19 = vld [vmem:[#allocation8 + $0x88] sm:$0xff] }
 0x385   : > { %4047 = vmatprep.mubr.msk.f32.mxu1 %vm1363_vm0, %v2614_v11  ;;  %4054 = vmatprep.mubr.msk.f32.mxu0 %vm1363_vm0, %v2616_v52  ;;  %v3323_v11 = vld [vmem:[#allocation8 + $0x78] sm:$0xff]  ;;  %v3322_v52 = vld [vmem:[#allocation8 + $0x70] sm:$0xff] }
 0x386   : > { %4048 = vmatmul.mubr.msk.f32.vlgmr.msra.gmra.mxu1 %vm1363_vm0, %v2615_v47  ;;  %4055 = vmatmul.mubr.msk.f32.vlgmr.msra.gmra.mxu0 %vm1363_vm0, %v2617_v58  ;;  %v3321_v47 = vld [vmem:[#allocation8 + $0x68] sm:$0xff]  ;;  %v3320_v58 = vld [vmem:[#allocation8 + $0x60] sm:$0xff] }
 0x387   : > { %4058 = vmatpush3.msra.mxu1 %v4613_v41  ;;  %4065 = vmatpush3.msra.mxu0 %v4629_v53 }
 0x388   : > { %v4007_v22 = vpop.f32.mrf.mxu1  ;;  %4059 = vmatprep.subr.mxu1 %v5157_v29  ;;  %4066 = vmatprep.subr.mxu0 %v5158_v35 }
 0x389   : > { %v4014_v5 = vpop.f32.mrf.mxu0  ;;  %4060 = vmatpush3.msra.mxu1 %v5157_v29  ;;  %4067 = vmatpush3.msra.mxu0 %v5158_v35  ;;  %v2619_v53 = vmul.f32 %v4007_v22, %v4812_v33  ;;  %v3319_v22 = vld [vmem:[#allocation8 + $0x58] sm:$0xff]  ;;  %v3318_v29 = vld [vmem:[#allocation8 + $0x50] sm:$0xff]  ;;  %v3317_v35 = vld [vmem:[#allocation8 + $0x48] sm:$0xff] }
 0x38a   : > { %v2303_v46 = vpop.f32.mrf.mxu1  ;;  %4071 = vmatprep.subr.mxu1 %v5159_v30  ;;  %4078 = vmatprep.subr.mxu0 %v5160_v0  ;;  %v2621_v9 = vmul.f32 %v4014_v5, %v4812_v33  ;;  %v3316_v5 = vld [vmem:[#allocation8 + $0x40] sm:$0xff] }
 0x38b   : > { %v2618_v32 = vmul.f32 %v2303_v46, %v4810_v28  ;;  %v2378_v41 = vpop.f32.mrf.mxu0  ;;  %v3315_v46 = vld [vmem:[#allocation8 + $0x38] sm:$0xff] }
 0x38c   : > { %v2620_v26 = vmul.f32 %v2378_v41, %v4810_v28  ;;  %v3311_v41 = vld [vmem:[#allocation8 + $0x18] sm:$0xff] }
 0x38d   : > { %4061 = vmatprep.mubr.msk.f32.mxu1 %vm1363_vm0, %v2618_v32  ;;  %v3312_v32 = vld [vmem:[#allocation8 + $0x20] sm:$0xff] }
 0x38e   : > { %4068 = vmatprep.mubr.msk.f32.mxu0 %vm1363_vm0, %v2620_v26  ;;  %4062 = vmatmul.mubr.msk.f32.vlgmr.msra.gmra.mxu1 %vm1363_vm0, %v2619_v53  ;;  %v3310_v53 = vld [vmem:[#allocation8 + $0x10] sm:$0xff]  ;;  %v3309_v26 = vld [vmem:[#allocation8 + $0x8] sm:$0xff] }
 0x38f   : > { %4069 = vmatmul.mubr.msk.f32.vlgmr.msra.gmra.mxu0 %vm1363_vm0, %v2621_v9  ;;  %4072 = vmatpush3.msra.mxu1 %v5159_v30  ;;  %v3314_v30 = vld [vmem:[#allocation8 + $0x30] sm:$0xff]  ;;  %v3308_v9 = vld [vmem:[#allocation8] sm:$0xff] }
 0x390   : > { %v4021_v14 = vpop.f32.mrf.mxu1  ;;  %4079 = vmatpush3.msra.mxu0 %v5160_v0  ;;  %4073 = vmatprep.subr.mxu1 %v5161_v44  ;;  %v3313_v0 = vld [vmem:[#allocation8 + $0x28] sm:$0xff] }
 0x391   : > { %v4028_v18 = vpop.f32.mrf.mxu0  ;;  %4080 = vmatprep.subr.mxu0 %v5162_v23  ;;  %4074 = vmatpush3.msra.mxu1 %v5161_v44  ;;  %v2623_v62 = vmul.f32 %v4021_v14, %v4812_v33  ;;  %v3371_v14 = vld [vmem:[#allocation8 + $0x1f8] sm:$0xff]  ;;  %v3370_v44 = vld [vmem:[#allocation8 + $0x1f0] sm:$0xff] }
 0x392   : > { %v2453_v56 = vpop.f32.mrf.mxu1  ;;  %4081 = vmatpush3.msra.mxu0 %v5162_v23  ;;  %4085 = vmatprep.subr.mxu1 %v5163_v50  ;;  %v2625_v20 = vmul.f32 %v4028_v18, %v4812_v33  ;;  %v3368_v18 = vld [vmem:[#allocation8 + $0x1e0] sm:$0xff]  ;;  %v3367_v23 = vld [vmem:[#allocation8 + $0x1d8] sm:$0xff] }
 0x393   : > { %v2622_v37 = vmul.f32 %v2453_v56, %v4810_v28  ;;  %v2528_v6 = vpop.f32.mrf.mxu0  ;;  %3372 = vmatprep.subr.mxu0 %v3339_v38  ;;  %v3369_v38 = vld [vmem:[#allocation8 + $0x1e8] sm:$0xff]  ;;  %v3366_v56 = vld [vmem:[#allocation8 + $0x1d0] sm:$0xff] }
 0x394   : > { %v2624_v55 = vmul.f32 %v2528_v6, %v4810_v28  ;;  %v3363_v6 = vld [vmem:[#allocation8 + $0x1b8] sm:$0xff] }
 0x395   : > { %4075 = vmatprep.mubr.msk.f32.mxu1 %vm1363_vm0, %v2622_v37  ;;  %v3364_v37 = vld [vmem:[#allocation8 + $0x1c0] sm:$0xff] }
 0x396   : > { %4082 = vmatprep.mubr.msk.f32.mxu0 %vm1363_vm0, %v2624_v55  ;;  %4076 = vmatmul.mubr.msk.f32.vlgmr.msra.gmra.mxu1 %vm1363_vm0, %v2623_v62  ;;  %v3362_v62 = vld [vmem:[#allocation8 + $0x1b0] sm:$0xff]  ;;  %v3361_v55 = vld [vmem:[#allocation8 + $0x1a8] sm:$0xff] }
 0x397   : > { %4083 = vmatmul.mubr.msk.f32.vlgmr.msra.gmra.mxu0 %vm1363_vm0, %v2625_v20  ;;  %4086 = vmatpush3.msra.mxu1 %v5163_v50  ;;  %v3365_v50 = vld [vmem:[#allocation8 + $0x1c8] sm:$0xff]  ;;  %v3360_v20 = vld [vmem:[#allocation8 + $0x1a0] sm:$0xff] }
 0x398   : > { %v4035_v7 = vpop.f32.mrf.mxu1  ;;  %4087 = vmatprep.subr.mxu1 %v5164_v43  ;;  %3373 = vmatpush1.msra.mxu0 %v3338_v25  ;;  %v3359_v25 = vld [vmem:[#allocation8 + $0x198] sm:$0xff] }
 0x399   : > { %4088 = vmatpush3.msra.mxu1 %v5164_v43  ;;  %3374 = vmatprep.subr.mxu0 %v3337_v15  ;;  %v2627_v31 = vmul.f32 %v4035_v7, %v4812_v33  ;;  %v3324_v33 = vld [vmem:[#allocation8 + $0x80] sm:$0xff]  ;;  %v3358_v15 = vld [vmem:[#allocation8 + $0x190] sm:$0xff]  ;;  %v3355_v43 = vld [vmem:[#allocation8 + $0x178] sm:$0xff] }
 0x39a   : > { %v2603_v61 = vpop.f32.mrf.mxu1  ;;  %3375 = vmatpush1.msra.mxu0 %v3336_v1  ;;  %v3357_v1 = vld [vmem:[#allocation8 + $0x188] sm:$0xff]  ;;  %v3356_v7 = vld [vmem:[#allocation8 + $0x180] sm:$0xff] }
 0x39b   : > { %v2626_v2 = vmul.f32 %v2603_v61, %v4810_v28  ;;  %3376 = vmatprep.subr.mxu0 %v3335_v42  ;;  %v3326_v28 = vld [vmem:[#allocation8 + $0x90] sm:$0xff]  ;;  %v3352_v61 = vld [vmem:[#allocation8 + $0x160] sm:$0xff] }
 0x39c   : > { %3377 = vmatpush1.msra.mxu0 %v3334_v34  ;;  %v3354_v42 = vld [vmem:[#allocation8 + $0x170] sm:$0xff]  ;;  %v3353_v34 = vld [vmem:[#allocation8 + $0x168] sm:$0xff] }
 0x39d   : > { %4089 = vmatprep.mubr.msk.f32.mxu1 %vm1363_vm0, %v2626_v2  ;;  %3378 = vmatprep.subr.mxu0 %v3333_v59  ;;  %v3351_v59 = vld [vmem:[#allocation8 + $0x158] sm:$0xff]  ;;  %v3350_v2 = vld [vmem:[#allocation8 + $0x150] sm:$0xff] }
 0x39e   : > { %4090 = vmatmul.mubr.msk.f32.vlgmr.msra.gmra.mxu1 %vm1363_vm0, %v2627_v31  ;;  %3379 = vmatpush1.msra.mxu0 %v3332_v21  ;;  %v3349_v21 = vld [vmem:[#allocation8 + $0x148] sm:$0xff]  ;;  %v3348_v31 = vld [vmem:[#allocation8 + $0x140] sm:$0xff] }
 0x39f   : > { %3380 = vmatprep.subr.mxu0 %v3331_v36  ;;  %v3347_v36 = vld [vmem:[#allocation8 + $0x138] sm:$0xff] }
 0x3a0   : > { %3381 = vmatpush1.msra.mxu0 %v3330_v40  ;;  %v3346_v40 = vld [vmem:[#allocation8 + $0x130] sm:$0xff] }
 0x3a1   : > { %3382 = vmatprep.subr.mxu0 %v3329_v48  ;;  %v3345_v48 = vld [vmem:[#allocation8 + $0x128] sm:$0xff] }
 0x3a2   : > { %3383 = vmatpush1.msra.mxu0 %v3328_v24  ;;  %v3344_v24 = vld [vmem:[#allocation8 + $0x120] sm:$0xff] }
 0x3a3   : > { %3384 = vmatprep.subr.mxu0 %v3327_v49  ;;  %v3343_v49 = vld [vmem:[#allocation8 + $0x118] sm:$0xff] }
 0x3a4   : > { %3385 = vmatpush1.msra.mxu0 %v3326_v28  ;;  %v3342_v28 = vld [vmem:[#allocation8 + $0x110] sm:$0xff] }
 0x3a5   : > { %3386 = vmatprep.subr.mxu0 %v3325_v19  ;;  %v3341_v19 = vld [vmem:[#allocation8 + $0x108] sm:$0xff] }
 0x3a6   : > { %3387 = vmatpush1.msra.mxu0 %v3324_v33  ;;  %v3340_v33 = vld [vmem:[#allocation8 + $0x100] sm:$0xff] }
 0x3a7   : > { %3388 = vmatprep.subr.mxu0 %v3323_v11 }
 0x3a8   : > { %3389 = vmatpush1.msra.mxu0 %v3322_v52 }
 0x3a9   : > { %3390 = vmatprep.subr.mxu0 %v3321_v47 }
 0x3aa   : > { %3391 = vmatpush1.msra.mxu0 %v3320_v58  ;;  %v3276_v58 = vmul.f32 2.0, %v4925_v39  ;;  %v3282_v39 = vmul.f32 2.0, %v4929_v51 }
 0x3ab   : > { %3392 = vmatprep.subr.mxu0 %v3319_v22 }
 0x3ac   : > { %3393 = vmatpush1.msra.mxu0 %v3318_v29  ;;  %v3278_v29 = vmul.f32 2.0, %v4923_v4  ;;  %v3284_v4 = vmul.f32 2.0, %v4931_v54 }
 0x3ad   : > { %3394 = vmatprep.subr.mxu0 %v3317_v35 }
 0x3ae   : > { %3395 = vmatpush1.msra.mxu0 %v3316_v5 }
 0x3af   : > { %3396 = vmatprep.subr.mxu0 %v3315_v46 }
 0x3b0   : > { %3397 = vmatpush1.msra.mxu0 %v3314_v30 }
 0x3b1   : > { %3398 = vmatprep.subr.mxu0 %v3313_v0  ;;  %v3280_v0 = vmul.f32 2.0, %v4933_v57 }
 0x3b2   : > { %3399 = vmatpush1.msra.mxu0 %v3312_v32 }
 0x3b3   : > { %3400 = vmatprep.subr.mxu0 %v3311_v41 }
 0x3b4   : > { %3401 = vmatpush1.msra.mxu0 %v3310_v53 }
 0x3b5   : > { %3402 = vmatprep.subr.mxu0 %v3309_v26 }
 0x3b6   : > { %3403 = vmatpush1.msra.mxu0 %v3308_v9 }
 0x3b7   : > { %3404 = vmatprep.subr.mxu0 %v3371_v14 }
 0x3b8   : > { %3405 = vmatpush2.msra.mxu0 %v3370_v44  ;;  %v3286_v44 = vmul.f32 2.0, %v4927_v13 }
 0x3b9   : > { %3406 = vmatprep.subr.mxu0 %v3369_v38 }
 0x3ba   : > { %3407 = vmatpush2.msra.mxu0 %v3368_v18  ;;  %v3288_v18 = vmul.f32 2.0, %v4941_v10 }
 0x3bb   : > { %3408 = vmatprep.subr.mxu0 %v3367_v23 }
 0x3bc   : > { %3409 = vmatpush2.msra.mxu0 %v3366_v56  ;;  %v3290_v56 = vmul.f32 2.0, %v4937_v16 }
 0x3bd   : > { %3410 = vmatprep.subr.mxu0 %v3365_v50 }
 0x3be   : > { %3411 = vmatpush2.msra.mxu0 %v3364_v37  ;;  %v3292_v37 = vmul.f32 2.0, %v4939_v63 }
 0x3bf   : > { %3412 = vmatprep.subr.mxu0 %v3363_v6 }
 0x3c0   : > { %3413 = vmatpush2.msra.mxu0 %v3362_v62  ;;  %v3294_v62 = vmul.f32 2.0, %v4935_v60 }
 0x3c1   : > { %3414 = vmatprep.subr.mxu0 %v3361_v55 }
 0x3c2   : > { %3415 = vmatpush2.msra.mxu0 %v3360_v20  ;;  %v3296_v20 = vmul.f32 2.0, %v4949_v17 }
 0x3c3   : > { %3416 = vmatprep.subr.mxu0 %v3359_v25 }
 0x3c4   : > { %3417 = vmatpush2.msra.mxu0 %v3358_v15  ;;  %v3298_v15 = vmul.f32 2.0, %v4945_v8  ;;  %v3306_v8 = vmul.f32 2.0, %v4951_v27 }
 0x3c5   : > { %3418 = vmatprep.subr.mxu0 %v3357_v1 }
 0x3c6   : > { %3419 = vmatpush2.msra.mxu0 %v3356_v7  ;;  %v3300_v7 = vmul.f32 2.0, %v4947_v12 }
 0x3c7   : > { %3420 = vmatprep.subr.mxu0 %v3355_v43 }
 0x3c8   : > { %3421 = vmatpush2.msra.mxu0 %v3354_v42  ;;  %v3302_v42 = vmul.f32 2.0, %v4943_v3 }
 0x3c9   : > { %3422 = vmatprep.subr.mxu0 %v3353_v34  ;;  %v3304_v34 = vmul.f32 2.0, %v4956_v45 }
 0x3ca   : > { %3423 = vmatpush2.msra.mxu0 %v3352_v61 }
 0x3cb   : > { %3424 = vmatprep.subr.mxu0 %v3351_v59 }
 0x3cc   : > { %3425 = vmatpush2.msra.mxu0 %v3350_v2 }
 0x3cd   : > { %3426 = vmatprep.subr.mxu0 %v3349_v21 }
 0x3ce   : > { %3427 = vmatpush2.msra.mxu0 %v3348_v31 }
 0x3cf   : > { %3428 = vmatprep.subr.mxu0 %v3347_v36 }
 0x3d0   : > { %3429 = vmatpush2.msra.mxu0 %v3346_v40 }
 0x3d1   : > { %3430 = vmatprep.subr.mxu0 %v3345_v48 }
 0x3d2   : > { %3431 = vmatpush2.msra.mxu0 %v3344_v24 }
 0x3d3   : > { %3432 = vmatprep.subr.mxu0 %v3343_v49 }
 0x3d4   : > { %3433 = vmatpush2.msra.mxu0 %v3342_v28 }
 0x3d5   : > { %3434 = vmatprep.subr.mxu0 %v3341_v19 }
 0x3d6   : > { %3435 = vmatpush2.msra.mxu0 %v3340_v33 }
 0x43e   : > { %v4042_v11 = vpop.f32.mrf.mxu0 }
 0x43f   : > { %v3279_v22 = vmul.f32 2.0, %v4042_v11 }
 0x440   : > { %v2700_v52 = vpop.f32.mrf.mxu0 }
 0x441   : > { %v3277_v47 = vmul.f32 2.0, %v2700_v52 }
 0x443   : > { %3436 = vmatprep.mubr.f32.mxu0 %v3277_v47 }
 0x444   : > { %3437 = vmatmul.mubr.f32.vlgmr.msra.gmra.mxu0 %v3276_v58 }
 0x445   : > { %3442 = vmatprep.mubr.f32.mxu0 %v3279_v22 }
 0x446   : > { %v4049_v35 = vpop.f32.mrf.mxu1  ;;  %v4056_v5 = vpop.f32.mrf.mxu0 }
 0x447   : > { %v3283_v32 = vmul.f32 2.0, %v4049_v35  ;;  %v3287_v9 = vmul.f32 2.0, %v4056_v5 }
 0x448   : > { %v2781_v46 = vpop.f32.mrf.mxu1  ;;  %3443 = vmatmul.mubr.f32.gmra.mxu0 %v3278_v29  ;;  %v2862_v41 = vpop.f32.mrf.mxu0 }
 0x449   : > { %v3281_v30 = vmul.f32 2.0, %v2781_v46  ;;  %v3285_v53 = vmul.f32 2.0, %v2862_v41 }
 0x44b   : > { %3448 = vmatprep.mubr.f32.mxu0 %v3281_v30 }
 0x44c   : > { %3449 = vmatmul.mubr.f32.gmra.mxu0 %v3280_v0 }
 0x44d   : > { %3454 = vmatprep.mubr.f32.mxu0 %v3283_v32 }
 0x44e   : > { %v4063_v26 = vpop.f32.mrf.mxu1 }
 0x44f   : > { %v4070_v38 = vpop.f32.mrf.mxu0  ;;  %v3291_v23 = vmul.f32 2.0, %v4063_v26 }
 0x450   : > { %3455 = vmatmul.mubr.f32.gmra.mxu0 %v3282_v39  ;;  %v2943_v14 = vpop.f32.mrf.mxu1  ;;  %v3295_v6 = vmul.f32 2.0, %v4070_v38 }
 0x451   : > { %3460 = vmatprep.mubr.f32.mxu0 %v3285_v53  ;;  %v3289_v57 = vmul.f32 2.0, %v2943_v14  ;;  %v3024_v51 = vpop.f32.mrf.mxu0 }
 0x452   : > { %v3293_v50 = vmul.f32 2.0, %v3024_v51 }
 0x454   : > { %3461 = vmatmul.mubr.f32.gmra.mxu0 %v3284_v4 }
 0x455   : > { %3466 = vmatprep.mubr.f32.mxu0 %v3287_v9 }
 0x456   : > { %v4077_v54 = vpop.f32.mrf.mxu1 }
 0x457   : > { %v4084_v10 = vpop.f32.mrf.mxu0  ;;  %v3299_v25 = vmul.f32 2.0, %v4077_v54 }
 0x458   : > { %3467 = vmatmul.mubr.f32.gmra.mxu0 %v3286_v44  ;;  %v3105_v13 = vpop.f32.mrf.mxu1  ;;  %v3303_v60 = vmul.f32 2.0, %v4084_v10 }
 0x459   : > { %3472 = vmatprep.mubr.f32.mxu0 %v3289_v57  ;;  %v3297_v55 = vmul.f32 2.0, %v3105_v13  ;;  %v3186_v16 = vpop.f32.mrf.mxu0 }
 0x45a   : > { %v3301_v1 = vmul.f32 2.0, %v3186_v16 }
 0x45c   : > { %3473 = vmatmul.mubr.f32.gmra.mxu0 %v3288_v18 }
 0x45d   : > { %3478 = vmatprep.mubr.f32.mxu0 %v3291_v23 }
 0x45e   : > { %v4091_v63 = vpop.f32.mrf.mxu1 }
 0x45f   : > { %v3307_v61 = vmul.f32 2.0, %v4091_v63 }
 0x460   : > { %3479 = vmatmul.mubr.f32.gmra.mxu0 %v3290_v56  ;;  %v3267_v43 = vpop.f32.mrf.mxu1 }
 0x461   : > { %3484 = vmatprep.mubr.f32.mxu0 %v3293_v50  ;;  %v3305_v17 = vmul.f32 2.0, %v3267_v43 }
 0x464   : > { %3485 = vmatmul.mubr.f32.gmra.mxu0 %v3292_v37 }
 0x465   : > { %3490 = vmatprep.mubr.f32.mxu0 %v3295_v6 }
 0x468   : > { %3491 = vmatmul.mubr.f32.gmra.mxu0 %v3294_v62 }
 0x469   : > { %3496 = vmatprep.mubr.f32.mxu0 %v3297_v55 }
 0x46c   : > { %3497 = vmatmul.mubr.f32.gmra.mxu0 %v3296_v20 }
 0x46d   : > { %3502 = vmatprep.mubr.f32.mxu0 %v3299_v25 }
 0x470   : > { %3503 = vmatmul.mubr.f32.gmra.mxu0 %v3298_v15 }
 0x471   : > { %3508 = vmatprep.mubr.f32.mxu0 %v3301_v1 }
 0x474   : > { %3509 = vmatmul.mubr.f32.gmra.mxu0 %v3300_v7 }
 0x475   : > { %3514 = vmatprep.mubr.f32.mxu0 %v3303_v60 }
 0x478   : > { %3515 = vmatmul.mubr.f32.gmra.mxu0 %v3302_v42 }
 0x479   : > { %3520 = vmatprep.mubr.f32.mxu0 %v3305_v17 }
 0x47c   : > { %3521 = vmatmul.mubr.f32.gmra.mxu0 %v3304_v34 }
 0x47d   : > { %3526 = vmatprep.mubr.f32.mxu0 %v3307_v61 }
 0x480   : > { %3527 = vmatmul.mubr.f32.gmra.mxu0 %v3306_v8 }
 0x504   : > { %v3438_v59 = vpop.f32.mrf.mxu0 }
 0x505   : > { %3533 = vst [vmem:[%s5027_s21] sm:$0xff] %v3438_v59 }
 0x506   : > { %v3440_v3 = vpop.f32.mrf.mxu0 }
 0x507   : > { %3534 = vst [vmem:[%s5027_s21 + $0x8] sm:$0xff] %v3440_v3 }
 0x508   : > { %v3444_v12 = vpop.f32.mrf.mxu0 }
 0x509   : > { %3535 = vst [vmem:[%s5027_s21 + $0x10] sm:$0xff] %v3444_v12 }
 0x50a   : > { %v3446_v27 = vpop.f32.mrf.mxu0 }
 0x50b   : > { %3536 = vst [vmem:[%s5027_s21 + $0x18] sm:$0xff] %v3446_v27 }
 0x50c   : > { %v3450_v45 = vpop.f32.mrf.mxu0 }
 0x50d   : > { %3537 = vst [vmem:[%s5027_s21 + $0x20] sm:$0xff] %v3450_v45 }
 0x50e   : > { %v3452_v2 = vpop.f32.mrf.mxu0 }
 0x50f   : > { %3538 = vst [vmem:[%s5027_s21 + $0x28] sm:$0xff] %v3452_v2 }
 0x510   : > { %v3456_v21 = vpop.f32.mrf.mxu0 }
 0x511   : > { %3539 = vst [vmem:[%s5027_s21 + $0x30] sm:$0xff] %v3456_v21 }
 0x512   : > { %v3458_v31 = vpop.f32.mrf.mxu0 }
 0x513   : > { %3540 = vst [vmem:[%s5027_s21 + $0x38] sm:$0xff] %v3458_v31 }
 0x514   : > { %v3462_v36 = vpop.f32.mrf.mxu0 }
 0x515   : > { %3541 = vst [vmem:[%s5027_s21 + $0x40] sm:$0xff] %v3462_v36 }
 0x516   : > { %v3464_v40 = vpop.f32.mrf.mxu0 }
 0x517   : > { %3542 = vst [vmem:[%s5027_s21 + $0x48] sm:$0xff] %v3464_v40 }
 0x518   : > { %v3468_v48 = vpop.f32.mrf.mxu0 }
 0x519   : > { %3543 = vst [vmem:[%s5027_s21 + $0x50] sm:$0xff] %v3468_v48 }
 0x51a   : > { %v3470_v24 = vpop.f32.mrf.mxu0 }
 0x51b   : > { %3544 = vst [vmem:[%s5027_s21 + $0x58] sm:$0xff] %v3470_v24 }
 0x51c   : > { %v3474_v49 = vpop.f32.mrf.mxu0 }
 0x51d   : > { %3545 = vst [vmem:[%s5027_s21 + $0x60] sm:$0xff] %v3474_v49 }
 0x51e   : > { %v3476_v28 = vpop.f32.mrf.mxu0 }
 0x51f   : > { %3546 = vst [vmem:[%s5027_s21 + $0x68] sm:$0xff] %v3476_v28 }
 0x520   : > { %v3480_v19 = vpop.f32.mrf.mxu0 }
 0x521   : > { %3547 = vst [vmem:[%s5027_s21 + $0x70] sm:$0xff] %v3480_v19 }
 0x522   : > { %v3482_v33 = vpop.f32.mrf.mxu0 }
 0x523   : > { %3548 = vst [vmem:[%s5027_s21 + $0x78] sm:$0xff] %v3482_v33 }
 0x524   : > { %v3486_v11 = vpop.f32.mrf.mxu0 }
 0x525   : > { %3549 = vst [vmem:[%s5027_s21 + $0x80] sm:$0xff] %v3486_v11 }
 0x526   : > { %v3488_v52 = vpop.f32.mrf.mxu0 }
 0x527   : > { %3550 = vst [vmem:[%s5027_s21 + $0x88] sm:$0xff] %v3488_v52 }
 0x528   : > { %v3492_v47 = vpop.f32.mrf.mxu0 }
 0x529   : > { %3551 = vst [vmem:[%s5027_s21 + $0x90] sm:$0xff] %v3492_v47 }
 0x52a   : > { %v3494_v58 = vpop.f32.mrf.mxu0 }
 0x52b   : > { %3552 = vst [vmem:[%s5027_s21 + $0x98] sm:$0xff] %v3494_v58 }
 0x52c   : > { %v3498_v22 = vpop.f32.mrf.mxu0 }
 0x52d   : > { %3553 = vst [vmem:[%s5027_s21 + $0xa0] sm:$0xff] %v3498_v22 }
 0x52e   : > { %v3500_v29 = vpop.f32.mrf.mxu0 }
 0x52f   : > { %3554 = vst [vmem:[%s5027_s21 + $0xa8] sm:$0xff] %v3500_v29 }
 0x530   : > { %v3504_v35 = vpop.f32.mrf.mxu0 }
 0x531   : > { %3555 = vst [vmem:[%s5027_s21 + $0xb0] sm:$0xff] %v3504_v35 }
 0x532   : > { %v3506_v5 = vpop.f32.mrf.mxu0 }
 0x533   : > { %3556 = vst [vmem:[%s5027_s21 + $0xb8] sm:$0xff] %v3506_v5 }
 0x534   : > { %v3510_v46 = vpop.f32.mrf.mxu0 }
 0x535   : > { %3557 = vst [vmem:[%s5027_s21 + $0xc0] sm:$0xff] %v3510_v46 }
 0x536   : > { %v3512_v30 = vpop.f32.mrf.mxu0 }
 0x537   : > { %3558 = vst [vmem:[%s5027_s21 + $0xc8] sm:$0xff] %v3512_v30 }
 0x538   : > { %v3516_v0 = vpop.f32.mrf.mxu0 }
 0x539   : > { %3559 = vst [vmem:[%s5027_s21 + $0xd0] sm:$0xff] %v3516_v0 }
 0x53a   : > { %v3518_v32 = vpop.f32.mrf.mxu0 }
 0x53b   : > { %3560 = vst [vmem:[%s5027_s21 + $0xd8] sm:$0xff] %v3518_v32 }
 0x53c   : > { %v3522_v41 = vpop.f32.mrf.mxu0 }
 0x53d   : > { %3561 = vst [vmem:[%s5027_s21 + $0xe0] sm:$0xff] %v3522_v41 }
 0x53e   : > { %v3524_v39 = vpop.f32.mrf.mxu0 }
 0x53f   : > { %3562 = vst [vmem:[%s5027_s21 + $0xe8] sm:$0xff] %v3524_v39 }
 0x540   : > { %v3528_v53 = vpop.f32.mrf.mxu0 }
 0x541   : > { %3563 = vst [vmem:[%s5027_s21 + $0xf0] sm:$0xff] %v3528_v53 }
 0x542   : > { %v3530_v26 = vpop.f32.mrf.mxu0 }
 0x543   : > { %3564 = vst [vmem:[%s5027_s21 + $0xf8] sm:$0xff] %v3530_v26 }
 0x544   : > { %4297 = shalt.err (!%p4294_p9)
}
 0x545   : > { %s4298_s11 = scalar_lea.hbm %s5064_s14, 4096  ;;  %s4302_s5 = scalar_lea.hbm %s5115_s4, 8192 }
 0x546   : > { %p4299_p7 = scmp.ne.s32.totalorder %s5064_s14, %s4298_s11  ;;  %p4303_p2 = scmp.lt.s32.totalorder %s5064_s14, %s5115_s4 }
 0x547   : > { %p4304_p11 = scmp.lt.s32.totalorder %s4302_s5, %s4298_s11 }
 0x548   : > { %p4300_p4 = pnand %p4299_p7, %p5165_p0 }
 0x549   : > { %p4305_p13 = por %p4304_p11, %p4303_p2 }
 0x54a   : > { %p4301_p8 = pneg %p4300_p4 }
 0x54c   : > { %p4306_p12 = pnand %p4305_p13, %p4301_p8 }
 0x54e   : > { %4309 = shalt.err (!%p4306_p12)
}
 0x54f   : > { %s4369_s21 = smov 256   ;;  %s4370_s23 = smov 16  }
 0x550   : > { %4106 = dma.vmem_to_hbm [thread:$0]  (%p5165_p0), %s5066_s24, 4096, %s5064_s14, %s3566_s27, %s4369_s21, %s4369_s21, %s4370_s23  }
 0x551 PF: > { %s3595_s25 = sand.u32 1, %s4344_s15   ;;  %p5166_p5 = scmp.ne.s32.totalorder %s5137_s22, 0 }
 0x552   : > { %p5167_p10 = scmp.ge.s32.totalorder %s4356_s18, 2  ;;  %s3596_s12 = scalar_lea.sflag [#allocation4], %s3595_s25 }
 0x554   : > { %p4123_p1 = pnand %p5167_p10, %p5166_p5 }
 0x556   : > { %p4124_p3 = pneg %p4123_p1 }
 0x558   : > { %4339 = dma.done.wait (%p4124_p3), %s3596_s12, 4096  }
 0x559   : > { %4341 = vsyncadd (%p4124_p3), %s3596_s12, 4294963200  ;;  %p19_p6 = scmp.ge.s32.totalorder %s4479_s29, 4   ;;  %s5168_s15 = smov %s4348_s16 }
 0x55a   : > { %s5169_s16 = smov %s4352_s17  ;;  %s5170_s17 = smov %s4489_s6 }
 0x55b   : > { %s5171_s18 = smov %s4479_s29  ;;  %21 = sbr.rel (!%p19_p6) target bundleno = 7 (0x7), region = 93 }
 0x560   :  { %3601 = vsyncpa [#allocation3], 1 }
 0x561   :  { %3603 = vsyncpa [#allocation3 + $0x1], 1 }
 0x562   :  { %3604 = vsyncpa [#allocation6], 1 }
 0x563   :  { %3605 = vsyncpa [#allocation9], 1 }
 0x564   :  { %3606 = vsyncpa [#allocation4], 1 }
 0x565   :  { %3608 = vsyncpa [#allocation4 + $0x1], 1 }

</bundles_post_ra>
